<compile_context>
chip_gen: v7x
topology: tpu7x:2x2x1
jax: 0.10.0
libtpu: 0.0.40
codegen_flags: <defaults>
</compile_context>

<pallas_src>
import jax
import jax.numpy as jnp
import numpy as np
from jax import lax
from jax.experimental import pallas as pl
from jax.experimental.pallas import tpu as pltpu

# ----- config (mirrors openvqa butd __C fields, small synthetic sizes) -------
WORD_EMBED_SIZE   = 16
HIDDEN_SIZE       = 32
FLAT_OUT_SIZE     = 64
IMG_FEAT_SIZE     = 32      # adapter projects frcn(+bbox) features to this
BBOXFEAT_EMB_SIZE = 16
FRCN_FEAT_SIZE    = 64
NUM_OBJ           = 8
SEQ_LEN           = 8
TOKEN_SIZE        = 50
ANSWER_SIZE       = 10
BATCH             = 2
LANE              = 128     # TPU lane width; padded widths
B_PAD             = 8       # batch padded to one sublane tile


# ---------------------------------------------------------------------------
# Fused kernel: LSTM -> adapter -> TDA (attention, q_net, v_net) -> classifier
# ---------------------------------------------------------------------------
def _net_fused_kernel(act_ref, w_ref, b_ref, out_ref):
    f32, bf16 = jnp.float32, jnp.bfloat16
    dot = lambda a, b: jnp.dot(a, b, preferred_element_type=f32)

    H, IMG, FLAT = HIDDEN_SIZE, IMG_FEAT_SIZE, FLAT_OUT_SIZE
    T, N, BP = SEQ_LEN, NUM_OBJ, B_PAD
    G = 4 * H                                    # == LANE

    # ---------------- activation slab (bf16) --------------------------------
    lang = act_ref[0:T * BP, :]                  # (T*BP, 128), WE lanes real
    img  = act_ref[T * BP:T * BP + BP * N, :]    # (BP*N, 128), F+5 lanes real

    # ---------------- weight slab (bf16, static 16-aligned row slices) ------
    r = 0
    w_ih  = w_ref[r:r + LANE, :]; r += LANE      # (128,128) contraction-padded, 4H out
    w_hh  = w_ref[r:r + H,    :]; r += H         # (32,128)
    w_adp = w_ref[r:r + LANE, :]; r += LANE      # (128,128): [:,:IMG]=v, [:,IMG:2IMG]=v->hid
    w_qf  = w_ref[r:r + H,    :]; r += H         # (32,128): [:,:H]=q->hid, [:,H:2H]=q_net
    w_vn  = w_ref[r:r + IMG,  :]; r += IMG       # (32,128): [:,:H]=v_net
    w_1   = w_ref[r:r + H,    :]; r += H         # (32,128): [:,:FLAT]=classifier hidden
    w_2   = w_ref[r:r + FLAT, :]; r += FLAT      # (64,128): answers (lane-padded)

    # ---------------- LSTM (fused gates, hoisted input projection) ----------
    xproj = dot(lang, w_ih) + b_ref[0:1, :]      # (T*BP, 4H) — one matmul for all steps

    lane_id = lax.broadcasted_iota(jnp.int32, (BP, G), 1)     # hoisted out of loop
    tanh_lane = (lane_id >= 2 * H) & (lane_id < 3 * H)        # gate order i, f, g, o

    h = jnp.zeros((BP, H), f32)
    c = jnp.zeros((BP, H), f32)
    for t in range(T):                           # static, fully unrolled (T=8)
        g = xproj[t * BP:(t + 1) * BP, :] + dot(h.astype(bf16), w_hh)   # (BP, 4H)
        a = jnp.where(tanh_lane, jnp.tanh(g), jax.nn.sigmoid(g))        # 2 full-width EUP ops
        c = a[:, H:2 * H] * c + a[:, 0:H] * a[:, 2 * H:3 * H]           # f*c + i*g~
        h = a[:, 3 * H:4 * H] * jnp.tanh(c)                             # o*tanh(c)
    q = h                                        # (BP, H) == lang_feat[:, -1]

    # ---------------- adapter + attn-hidden (one fused matmul) --------------
    av = dot(img, w_adp)                         # (BP*N, 128)
    v = av[:, 0:IMG] + b_ref[1:2, 0:IMG]         # adapter output (pre wv projection)
    v_hid = av[:, IMG:2 * IMG]                   # v contribution to attn hidden (bias folded)

    # ---------------- q-side fused matmul (shared LHS) -----------------------
    qf = dot(q.astype(bf16), w_qf)               # (BP, 128)
    q_hid = qf[:, 0:H]
    q_repr = jnp.maximum(qf[:, H:2 * H] + b_ref[5:6, 0:H], 0.0)

    # ---------------- TDA AttnMap -------------------------------------------
    hid = v_hid.reshape(BP, N, H) + q_hid[:, None, :] + b_ref[2:3, 0:H]
    hid = jnp.maximum(hid, 0.0)                  # (BP, N, H)
    wl = b_ref[3:4, 0:H]                         # attention logit vector (1, H)
    logits = jnp.sum(hid * wl, axis=-1) + b_ref[4:5, 0:1]     # (BP, N) lane layout
    m = jnp.max(logits, axis=-1, keepdims=True)
    e = jnp.exp(logits - m)
    att = e * pl.reciprocal(jnp.sum(e, axis=-1, keepdims=True), approx=True)
    atted_v = jnp.sum(att[:, :, None] * v.reshape(BP, N, IMG), axis=1)  # (BP, IMG)

    # ---------------- v_net + classifier -------------------------------------
    v_repr = jnp.maximum(dot(atted_v.astype(bf16), w_vn)[:, 0:H] + b_ref[6:7, 0:H], 0.0)
    joint = q_repr * v_repr                                             # (BP, H)
    h1 = jnp.maximum(dot(joint.astype(bf16), w_1)[:, 0:FLAT] + b_ref[7:8, 0:FLAT], 0.0)
    out_ref[...] = dot(h1.astype(bf16), w_2) + b_ref[8:9, :]            # (BP, 128) lane-dense


# ---------------------------------------------------------------------------
# Parameters (deterministic synthetic init — shapes follow the module __init__)
# ---------------------------------------------------------------------------
def init_params(key):
    shapes = {
        'emb':    (TOKEN_SIZE, WORD_EMBED_SIZE),
        'w_ih':   (4, WORD_EMBED_SIZE, HIDDEN_SIZE),     # LSTM input weights (i,f,g,o)
        'w_hh':   (4, HIDDEN_SIZE, HIDDEN_SIZE),         # LSTM recurrent weights
        'b_lstm': (4, 1, HIDDEN_SIZE),                   # b_ih + b_hh folded
        'wb':  (5, BBOXFEAT_EMB_SIZE),       'bb':  (1, BBOXFEAT_EMB_SIZE),
        'wf':  (FRCN_FEAT_SIZE, IMG_FEAT_SIZE),
        'wfb': (BBOXFEAT_EMB_SIZE, IMG_FEAT_SIZE),
        'bf':  (1, IMG_FEAT_SIZE),
        'wv':  (IMG_FEAT_SIZE, IMG_FEAT_SIZE), 'bv': (1, IMG_FEAT_SIZE),
        'wq':  (HIDDEN_SIZE, HIDDEN_SIZE),     'bq': (1, HIDDEN_SIZE),
        'wnv': (IMG_FEAT_SIZE, HIDDEN_SIZE),
        'wnq': (HIDDEN_SIZE, HIDDEN_SIZE),
        'bn':  (1, HIDDEN_SIZE),
        'wl':  (HIDDEN_SIZE, 1),               'bl': (1, 1),
        'wqn': (HIDDEN_SIZE, HIDDEN_SIZE),     'bqn': (1, HIDDEN_SIZE),
        'wvn': (IMG_FEAT_SIZE, HIDDEN_SIZE),   'bvn': (1, HIDDEN_SIZE),
        'w1':  (HIDDEN_SIZE, FLAT_OUT_SIZE),   'b1': (1, FLAT_OUT_SIZE),
        'w2':  (FLAT_OUT_SIZE, ANSWER_SIZE),   'b2': (1, ANSWER_SIZE),
    }
    keys = jax.random.split(key, len(shapes))
    params = {}
    for (name, shape), k in zip(shapes.items(), keys):
        scale = 0.5 if name == 'emb' else 0.1
        params[name] = jax.random.normal(k, shape, jnp.float32) * scale
    return params


# ---------------------------------------------------------------------------
# Net.forward equivalent (host side: gather glue + lane/sublane-dense packing)
# ---------------------------------------------------------------------------
def _net_forward(params, frcn_feat, grid_feat, bbox_feat, ques_ix):
    # TODO(synk): grid_feat is only consumed by the GQA/CLEVR adapter branches;
    # the VQA BUTD adapter path ignores it, so it is unused here.
    del grid_feat
    B, N, F = frcn_feat.shape
    T = ques_ix.shape[1]
    H, WE, IMG = HIDDEN_SIZE, WORD_EMBED_SIZE, IMG_FEAT_SIZE
    FLAT, A = FLAT_OUT_SIZE, ANSWER_SIZE
    BP = B_PAD
    assert B <= BP and T == SEQ_LEN and N == NUM_OBJ and F == FRCN_FEAT_SIZE
    assert IMG == H and 4 * H == LANE
    assert F + 5 <= LANE and 2 * IMG <= LANE and FLAT <= LANE and A <= LANE
    assert (T * BP) % 16 == 0 and (BP * N) % 16 == 0   # bf16 row-tile alignment

    f32, bf16 = jnp.float32, jnp.bfloat16
    hdot = lambda a, b: jnp.dot(a, b, precision=lax.Precision.HIGHEST)  # weight folds (f32)
    row128 = lambda x: jnp.pad(x, ((0, 0), (0, LANE - x.shape[1])))

    # --- activation slab: [lang (time-major, batch+lane padded) ; img_in] ---
    lang = jnp.take(params['emb'], ques_ix, axis=0)                     # (B,T,WE)
    lang = jnp.pad(lang, ((0, BP - B), (0, 0), (0, 0)))                 # (BP,T,WE)
    lang_tb = jnp.transpose(lang, (1, 0, 2)).reshape(T * BP, WE)
    lang_tb = jnp.pad(lang_tb, ((0, 0), (0, LANE - WE)))                # (T*BP,128)

    img_in = jnp.concatenate(
        [frcn_feat.reshape(B * N, F), bbox_feat.reshape(B * N, 5)], axis=-1)
    img_in = jnp.pad(img_in, ((0, 0), (0, LANE - (F + 5))))             # (B*N,128)
    img_in = jnp.pad(img_in.reshape(B, N, LANE),
                     ((0, BP - B), (0, 0), (0, 0))).reshape(BP * N, LANE)

    act = jnp.concatenate([lang_tb, img_in], axis=0).astype(bf16)       # (128,128)

    # --- LSTM weights (fused gates i,f,g,o; input weights contraction-padded)
    w_ih_cat = jnp.concatenate([params['w_ih'][k] for k in range(4)], axis=-1)   # (WE,4H)
    w_hh_cat = jnp.concatenate([params['w_hh'][k] for k in range(4)], axis=-1)   # (H,4H)
    b_lstm_cat = jnp.concatenate([params['b_lstm'][k] for k in range(4)], axis=-1)
    w_ih_pad = jnp.pad(w_ih_cat, ((0, LANE - WE), (0, 0)))                       # (128,128)

    # --- adapter fold + v->attn-hidden fold (exact algebra, f32 HIGHEST) ----
    w_bbox_fold = hdot(params['wb'], params['wfb'])                      # (5, IMG)
    w_ad = jnp.concatenate([params['wf'], w_bbox_fold], axis=0)          # (F+5, IMG)
    b_v = params['bf'] + hdot(params['bb'], params['wfb'])               # (1, IMG)
    w_vh = hdot(params['wv'], params['wnv'])                             # (IMG, H)
    w_qh = hdot(params['wq'], params['wnq'])                             # (H, H)
    b_hidden = (hdot(params['bv'], params['wnv'])
                + hdot(params['bq'], params['wnq']) + params['bn'])      # (1, H)
    b_hid_total = hdot(b_v, w_vh) + b_hidden                             # (1, H)

    w_ad_fused = jnp.concatenate([w_ad, hdot(w_ad, w_vh)], axis=1)       # (F+5, 2*IMG)
    w_ad_fused = jnp.pad(w_ad_fused,
                         ((0, LANE - (F + 5)), (0, LANE - 2 * IMG)))     # (128,128)

    w_q_fused = jnp.concatenate([w_qh, params['wqn']], axis=1)           # (H, 2H)
    w_q_fused = jnp.pad(w_q_fused, ((0, 0), (0, LANE - 2 * H)))          # (32,128)

    w_vn_p = row128(params['wvn'])                                       # (32,128)
    w_1_p  = row128(params['w1'])                                        # (32,128)
    w_2_p  = row128(params['w2'])                                        # (64,128)

    w_slab = jnp.concatenate(
        [w_ih_pad, w_hh_cat, w_ad_fused, w_q_fused, w_vn_p, w_1_p, w_2_p],
        axis=0).astype(bf16)                                             # (448,128) bf16

    # --- bias / small-vector slab (f32, one row each, zero-padded lanes) ----
    b_slab = jnp.concatenate([
        row128(b_lstm_cat),       # row 0: LSTM bias (b_ih + b_hh), 4H wide
        row128(b_v),              # row 1: adapter bias (folded)
        row128(b_hid_total),      # row 2: attention-MLP bias (fully folded)
        row128(params['wl'].T),   # row 3: attention logit vector
        row128(params['bl']),     # row 4: attention logit bias at [4, 0]
        row128(params['bqn']),    # row 5: q_net bias
        row128(params['bvn']),    # row 6: v_net bias
        row128(params['b1']),     # row 7: classifier hidden bias
        row128(params['b2']),     # row 8: classifier output bias
    ], axis=0).astype(f32)        # (9, 128)

    # --- cost hint for the XLA scheduler (latency-bound fused call) ---------
    flops = 2 * (T * BP * LANE * LANE            # hoisted input projection
                 + T * BP * H * LANE             # LSTM recurrence
                 + BP * N * LANE * LANE          # fused adapter + v->hid
                 + BP * H * LANE                 # fused q matmul
                 + BP * IMG * LANE + BP * H * LANE + BP * FLAT * LANE)
    transcendentals = T * BP * (2 * LANE + H) + BP * N
    bytes_accessed = (act.size + w_slab.size) * 2 + b_slab.size * 4 + BP * LANE * 4
    cost = pl.CostEstimate(flops=flops, transcendentals=transcendentals,
                           bytes_accessed=bytes_accessed)

    vmem = pl.BlockSpec(memory_space=pltpu.MemorySpace.VMEM)
    out = pl.pallas_call(
        _net_fused_kernel,
        out_shape=jax.ShapeDtypeStruct((BP, LANE), jnp.float32),
        in_specs=[vmem, vmem, vmem],
        out_specs=vmem,
        cost_estimate=cost,
    )(act, w_slab, b_slab)
    return out[:B, :A]


net_forward = jax.jit(_net_forward)


# ---------------------------------------------------------------------------
# Pure-JAX reference (unfused math) for a sanity check
# ---------------------------------------------------------------------------
def reference_forward(params, frcn, grid, bbox, ques_ix):
    hp = lax.Precision.HIGHEST
    dot = lambda a, b: jnp.dot(a, b, precision=hp)
    lang = jnp.take(params['emb'], ques_ix, axis=0)
    B, T, _ = lang.shape
    h = jnp.zeros((B, HIDDEN_SIZE), jnp.float32)
    c = jnp.zeros((B, HIDDEN_SIZE), jnp.float32)
    for t in range(T):
        x_t = lang[:, t, :]
        g = [dot(x_t, params['w_ih'][k]) + dot(h, params['w_hh'][k]) + params['b_lstm'][k]
             for k in range(4)]
        c = jax.nn.sigmoid(g[1]) * c + jax.nn.sigmoid(g[0]) * jnp.tanh(g[2])
        h = jax.nn.sigmoid(g[3]) * jnp.tanh(c)
    q = h
    bbox_emb = jnp.einsum('bnc,ce->bne', bbox, params['wb'], precision=hp) + params['bb']
    v = (jnp.einsum('bnf,fh->bnh', frcn, params['wf'], precision=hp)
         + jnp.einsum('bne,eh->bnh', bbox_emb, params['wfb'], precision=hp)
         + params['bf'])
    v_proj = jnp.einsum('bnh,hk->bnk', v, params['wv'], precision=hp) + params['bv']
    q_proj = dot(q, params['wq']) + params['bq']
    hidden = jax.nn.relu(jnp.einsum('bnk,kh->bnh', v_proj, params['wnv'], precision=hp)
                         + dot(q_proj, params['wnq'])[:, None, :] + params['bn'])
    logits = jnp.einsum('bnh,ho->bno', hidden, params['wl'], precision=hp) + params['bl']
    att = jax.nn.softmax(logits, axis=1)
    atted_v = jnp.sum(att * v, axis=1)
    q_repr = jax.nn.relu(dot(q, params['wqn']) + params['bqn'])
    v_repr = jax.nn.relu(dot(atted_v, params['wvn']) + params['bvn'])
    joint = q_repr * v_repr
    h1 = jax.nn.relu(dot(joint, params['w1']) + params['b1'])
    return dot(h1, params['w2']) + params['b2']


if __name__ == "__main__":
    key = jax.random.PRNGKey(0)
    k_param, k_frcn, k_grid, k_bbox, k_ques = jax.random.split(key, 5)
    params = init_params(k_param)

    frcn_feat = jax.random.normal(k_frcn, (BATCH, NUM_OBJ, FRCN_FEAT_SIZE), jnp.float32)
    grid_feat = jax.random.normal(k_grid, (BATCH, 16, 32), jnp.float32)
    bbox_feat = jax.random.uniform(k_bbox, (BATCH, NUM_OBJ, 5), jnp.float32)
    ques_ix = jax.random.randint(k_ques, (BATCH, SEQ_LEN), 0, TOKEN_SIZE)

    out = net_forward(params, frcn_feat, grid_feat, bbox_feat, ques_ix)
    out = jax.block_until_ready(out)
    assert out.shape == (BATCH, ANSWER_SIZE)

    ref = reference_forward(params, frcn_feat, grid_feat, bbox_feat, ques_ix)
    np.testing.assert_allclose(np.asarray(out), np.asarray(ref), rtol=5e-2, atol=5e-2)

    print("KERNEL_OK")
</pallas_src>

<mosaic_0001>
module attributes {stable_mosaic.version = 11 : i64} {
  func.func @_net_fused_kernel(%arg0: memref<128x128xbf16, #tpu.memory_space<vmem>>, %arg1: memref<448x128xbf16, #tpu.memory_space<vmem>>, %arg2: memref<9x128xf32, #tpu.memory_space<vmem>>, %arg3: memref<8x128xf32, #tpu.memory_space<vmem>>) attributes {dimension_semantics = [], scalar_prefetch = 0 : i64, scratch_operands = 0 : i64, tpu.core_type = #tpu.core_type<tc>} {
    %c0 = arith.constant 0 : index
    %c0_0 = arith.constant 0 : index
    %0 = vector.load %arg0[%c0, %c0_0] : memref<128x128xbf16, #tpu.memory_space<vmem>>, vector<64x128xbf16>
    %c64 = arith.constant 64 : index
    %c0_1 = arith.constant 0 : index
    %1 = vector.load %arg0[%c64, %c0_1] : memref<128x128xbf16, #tpu.memory_space<vmem>>, vector<64x128xbf16>
    %c0_2 = arith.constant 0 : index
    %c0_3 = arith.constant 0 : index
    %2 = vector.load %arg1[%c0_2, %c0_3] : memref<448x128xbf16, #tpu.memory_space<vmem>>, vector<128x128xbf16>
    %c128 = arith.constant 128 : index
    %c0_4 = arith.constant 0 : index
    %3 = vector.load %arg1[%c128, %c0_4] : memref<448x128xbf16, #tpu.memory_space<vmem>>, vector<32x128xbf16>
    %c160 = arith.constant 160 : index
    %c0_5 = arith.constant 0 : index
    %4 = vector.load %arg1[%c160, %c0_5] : memref<448x128xbf16, #tpu.memory_space<vmem>>, vector<128x128xbf16>
    %c288 = arith.constant 288 : index
    %c0_6 = arith.constant 0 : index
    %5 = vector.load %arg1[%c288, %c0_6] : memref<448x128xbf16, #tpu.memory_space<vmem>>, vector<32x128xbf16>
    %c320 = arith.constant 320 : index
    %c0_7 = arith.constant 0 : index
    %6 = vector.load %arg1[%c320, %c0_7] : memref<448x128xbf16, #tpu.memory_space<vmem>>, vector<32x128xbf16>
    %c352 = arith.constant 352 : index
    %c0_8 = arith.constant 0 : index
    %7 = vector.load %arg1[%c352, %c0_8] : memref<448x128xbf16, #tpu.memory_space<vmem>>, vector<32x128xbf16>
    %c384 = arith.constant 384 : index
    %c0_9 = arith.constant 0 : index
    %8 = vector.load %arg1[%c384, %c0_9] : memref<448x128xbf16, #tpu.memory_space<vmem>>, vector<64x128xbf16>
    %cst = arith.constant dense<0.000000e+00> : vector<64x128xf32>
    %9 = tpu.matmul %0, %2, %cst {dimension_numbers = #tpu.dot_dimension_numbers<[1], [0], [0], [1], [0, 0, 1, 1], [], []>} : vector<64x128xbf16>, vector<128x128xbf16>, vector<64x128xf32> -> vector<64x128xf32>
    %c0_10 = arith.constant 0 : index
    %c0_11 = arith.constant 0 : index
    %10 = vector.load %arg2[%c0_10, %c0_11] : memref<9x128xf32, #tpu.memory_space<vmem>>, vector<1x128xf32>
    %11 = vector.broadcast %10 : vector<1x128xf32> to vector<64x128xf32>
    %12 = arith.addf %9, %11 : vector<64x128xf32>
    %13 = tpu.iota {dimensions = array<i32: 1>} : vector<8x128xi32>
    %c64_i32 = arith.constant 64 : i32
    %14 = vector.broadcast %c64_i32 : i32 to vector<8x128xi32>
    %15 = arith.cmpi sge, %13, %14 : vector<8x128xi32>
    %c96_i32 = arith.constant 96 : i32
    %16 = vector.broadcast %c96_i32 : i32 to vector<8x128xi32>
    %17 = arith.cmpi slt, %13, %16 : vector<8x128xi32>
    %18 = arith.andi %15, %17 : vector<8x128xi1>
    %cst_12 = arith.constant 0.000000e+00 : f32
    %19 = vector.broadcast %cst_12 : f32 to vector<8x32xf32>
    %cst_13 = arith.constant 0.000000e+00 : f32
    %20 = vector.broadcast %cst_13 : f32 to vector<8x32xf32>
    %21 = vector.extract_strided_slice %12 {offsets = [0, 0], sizes = [8, 128], strides = [1, 1]} : vector<64x128xf32> to vector<8x128xf32>
    %22 = arith.truncf %19 : vector<8x32xf32> to vector<8x32xbf16>
    %cst_14 = arith.constant dense<0.000000e+00> : vector<8x128xf32>
    %23 = tpu.matmul %22, %3, %cst_14 {dimension_numbers = #tpu.dot_dimension_numbers<[1], [0], [0], [1], [0, 0, 1, 1], [], []>} : vector<8x32xbf16>, vector<32x128xbf16>, vector<8x128xf32> -> vector<8x128xf32>
    %24 = arith.addf %21, %23 : vector<8x128xf32>
    %25 = math.tanh %24 : vector<8x128xf32>
    %26 = arith.negf %24 : vector<8x128xf32>
    %27 = math.exp %26 : vector<8x128xf32>
    %cst_15 = arith.constant 1.000000e+00 : f32
    %28 = vector.broadcast %cst_15 : f32 to vector<8x128xf32>
    %29 = arith.addf %28, %27 : vector<8x128xf32>
    %30 = arith.divf %28, %29 : vector<8x128xf32>
    %31 = arith.select %18, %25, %30 : vector<8x128xi1>, vector<8x128xf32>
    %32 = vector.extract_strided_slice %31 {offsets = [0, 32], sizes = [8, 32], strides = [1, 1]} : vector<8x128xf32> to vector<8x32xf32>
    %33 = arith.mulf %32, %20 : vector<8x32xf32>
    %34 = vector.extract_strided_slice %31 {offsets = [0, 0], sizes = [8, 32], strides = [1, 1]} : vector<8x128xf32> to vector<8x32xf32>
    %35 = vector.extract_strided_slice %31 {offsets = [0, 64], sizes = [8, 32], strides = [1, 1]} : vector<8x128xf32> to vector<8x32xf32>
    %36 = arith.mulf %34, %35 : vector<8x32xf32>
    %37 = arith.addf %33, %36 : vector<8x32xf32>
    %38 = vector.extract_strided_slice %31 {offsets = [0, 96], sizes = [8, 32], strides = [1, 1]} : vector<8x128xf32> to vector<8x32xf32>
    %39 = math.tanh %37 : vector<8x32xf32>
    %40 = arith.mulf %38, %39 : vector<8x32xf32>
    %41 = vector.extract_strided_slice %12 {offsets = [8, 0], sizes = [8, 128], strides = [1, 1]} : vector<64x128xf32> to vector<8x128xf32>
    %42 = arith.truncf %40 : vector<8x32xf32> to vector<8x32xbf16>
    %cst_16 = arith.constant dense<0.000000e+00> : vector<8x128xf32>
    %43 = tpu.matmul %42, %3, %cst_16 {dimension_numbers = #tpu.dot_dimension_numbers<[1], [0], [0], [1], [0, 0, 1, 1], [], []>} : vector<8x32xbf16>, vector<32x128xbf16>, vector<8x128xf32> -> vector<8x128xf32>
    %44 = arith.addf %41, %43 : vector<8x128xf32>
    %45 = math.tanh %44 : vector<8x128xf32>
    %46 = arith.negf %44 : vector<8x128xf32>
    %47 = math.exp %46 : vector<8x128xf32>
    %cst_17 = arith.constant 1.000000e+00 : f32
    %48 = vector.broadcast %cst_17 : f32 to vector<8x128xf32>
    %49 = arith.addf %48, %47 : vector<8x128xf32>
    %50 = arith.divf %48, %49 : vector<8x128xf32>
    %51 = arith.select %18, %45, %50 : vector<8x128xi1>, vector<8x128xf32>
    %52 = vector.extract_strided_slice %51 {offsets = [0, 32], sizes = [8, 32], strides = [1, 1]} : vector<8x128xf32> to vector<8x32xf32>
    %53 = arith.mulf %52, %37 : vector<8x32xf32>
    %54 = vector.extract_strided_slice %51 {offsets = [0, 0], sizes = [8, 32], strides = [1, 1]} : vector<8x128xf32> to vector<8x32xf32>
    %55 = vector.extract_strided_slice %51 {offsets = [0, 64], sizes = [8, 32], strides = [1, 1]} : vector<8x128xf32> to vector<8x32xf32>
    %56 = arith.mulf %54, %55 : vector<8x32xf32>
    %57 = arith.addf %53, %56 : vector<8x32xf32>
    %58 = vector.extract_strided_slice %51 {offsets = [0, 96], sizes = [8, 32], strides = [1, 1]} : vector<8x128xf32> to vector<8x32xf32>
    %59 = math.tanh %57 : vector<8x32xf32>
    %60 = arith.mulf %58, %59 : vector<8x32xf32>
    %61 = vector.extract_strided_slice %12 {offsets = [16, 0], sizes = [8, 128], strides = [1, 1]} : vector<64x128xf32> to vector<8x128xf32>
    %62 = arith.truncf %60 : vector<8x32xf32> to vector<8x32xbf16>
    %cst_18 = arith.constant dense<0.000000e+00> : vector<8x128xf32>
    %63 = tpu.matmul %62, %3, %cst_18 {dimension_numbers = #tpu.dot_dimension_numbers<[1], [0], [0], [1], [0, 0, 1, 1], [], []>} : vector<8x32xbf16>, vector<32x128xbf16>, vector<8x128xf32> -> vector<8x128xf32>
    %64 = arith.addf %61, %63 : vector<8x128xf32>
    %65 = math.tanh %64 : vector<8x128xf32>
    %66 = arith.negf %64 : vector<8x128xf32>
    %67 = math.exp %66 : vector<8x128xf32>
    %cst_19 = arith.constant 1.000000e+00 : f32
    %68 = vector.broadcast %cst_19 : f32 to vector<8x128xf32>
    %69 = arith.addf %68, %67 : vector<8x128xf32>
    %70 = arith.divf %68, %69 : vector<8x128xf32>
    %71 = arith.select %18, %65, %70 : vector<8x128xi1>, vector<8x128xf32>
    %72 = vector.extract_strided_slice %71 {offsets = [0, 32], sizes = [8, 32], strides = [1, 1]} : vector<8x128xf32> to vector<8x32xf32>
    %73 = arith.mulf %72, %57 : vector<8x32xf32>
    %74 = vector.extract_strided_slice %71 {offsets = [0, 0], sizes = [8, 32], strides = [1, 1]} : vector<8x128xf32> to vector<8x32xf32>
    %75 = vector.extract_strided_slice %71 {offsets = [0, 64], sizes = [8, 32], strides = [1, 1]} : vector<8x128xf32> to vector<8x32xf32>
    %76 = arith.mulf %74, %75 : vector<8x32xf32>
    %77 = arith.addf %73, %76 : vector<8x32xf32>
    %78 = vector.extract_strided_slice %71 {offsets = [0, 96], sizes = [8, 32], strides = [1, 1]} : vector<8x128xf32> to vector<8x32xf32>
    %79 = math.tanh %77 : vector<8x32xf32>
    %80 = arith.mulf %78, %79 : vector<8x32xf32>
    %81 = vector.extract_strided_slice %12 {offsets = [24, 0], sizes = [8, 128], strides = [1, 1]} : vector<64x128xf32> to vector<8x128xf32>
    %82 = arith.truncf %80 : vector<8x32xf32> to vector<8x32xbf16>
    %cst_20 = arith.constant dense<0.000000e+00> : vector<8x128xf32>
    %83 = tpu.matmul %82, %3, %cst_20 {dimension_numbers = #tpu.dot_dimension_numbers<[1], [0], [0], [1], [0, 0, 1, 1], [], []>} : vector<8x32xbf16>, vector<32x128xbf16>, vector<8x128xf32> -> vector<8x128xf32>
    %84 = arith.addf %81, %83 : vector<8x128xf32>
    %85 = math.tanh %84 : vector<8x128xf32>
    %86 = arith.negf %84 : vector<8x128xf32>
    %87 = math.exp %86 : vector<8x128xf32>
    %cst_21 = arith.constant 1.000000e+00 : f32
    %88 = vector.broadcast %cst_21 : f32 to vector<8x128xf32>
    %89 = arith.addf %88, %87 : vector<8x128xf32>
    %90 = arith.divf %88, %89 : vector<8x128xf32>
    %91 = arith.select %18, %85, %90 : vector<8x128xi1>, vector<8x128xf32>
    %92 = vector.extract_strided_slice %91 {offsets = [0, 32], sizes = [8, 32], strides = [1, 1]} : vector<8x128xf32> to vector<8x32xf32>
    %93 = arith.mulf %92, %77 : vector<8x32xf32>
    %94 = vector.extract_strided_slice %91 {offsets = [0, 0], sizes = [8, 32], strides = [1, 1]} : vector<8x128xf32> to vector<8x32xf32>
    %95 = vector.extract_strided_slice %91 {offsets = [0, 64], sizes = [8, 32], strides = [1, 1]} : vector<8x128xf32> to vector<8x32xf32>
    %96 = arith.mulf %94, %95 : vector<8x32xf32>
    %97 = arith.addf %93, %96 : vector<8x32xf32>
    %98 = vector.extract_strided_slice %91 {offsets = [0, 96], sizes = [8, 32], strides = [1, 1]} : vector<8x128xf32> to vector<8x32xf32>
    %99 = math.tanh %97 : vector<8x32xf32>
    %100 = arith.mulf %98, %99 : vector<8x32xf32>
    %101 = vector.extract_strided_slice %12 {offsets = [32, 0], sizes = [8, 128], strides = [1, 1]} : vector<64x128xf32> to vector<8x128xf32>
    %102 = arith.truncf %100 : vector<8x32xf32> to vector<8x32xbf16>
    %cst_22 = arith.constant dense<0.000000e+00> : vector<8x128xf32>
    %103 = tpu.matmul %102, %3, %cst_22 {dimension_numbers = #tpu.dot_dimension_numbers<[1], [0], [0], [1], [0, 0, 1, 1], [], []>} : vector<8x32xbf16>, vector<32x128xbf16>, vector<8x128xf32> -> vector<8x128xf32>
    %104 = arith.addf %101, %103 : vector<8x128xf32>
    %105 = math.tanh %104 : vector<8x128xf32>
    %106 = arith.negf %104 : vector<8x128xf32>
    %107 = math.exp %106 : vector<8x128xf32>
    %cst_23 = arith.constant 1.000000e+00 : f32
    %108 = vector.broadcast %cst_23 : f32 to vector<8x128xf32>
    %109 = arith.addf %108, %107 : vector<8x128xf32>
    %110 = arith.divf %108, %109 : vector<8x128xf32>
    %111 = arith.select %18, %105, %110 : vector<8x128xi1>, vector<8x128xf32>
    %112 = vector.extract_strided_slice %111 {offsets = [0, 32], sizes = [8, 32], strides = [1, 1]} : vector<8x128xf32> to vector<8x32xf32>
    %113 = arith.mulf %112, %97 : vector<8x32xf32>
    %114 = vector.extract_strided_slice %111 {offsets = [0, 0], sizes = [8, 32], strides = [1, 1]} : vector<8x128xf32> to vector<8x32xf32>
    %115 = vector.extract_strided_slice %111 {offsets = [0, 64], sizes = [8, 32], strides = [1, 1]} : vector<8x128xf32> to vector<8x32xf32>
    %116 = arith.mulf %114, %115 : vector<8x32xf32>
    %117 = arith.addf %113, %116 : vector<8x32xf32>
    %118 = vector.extract_strided_slice %111 {offsets = [0, 96], sizes = [8, 32], strides = [1, 1]} : vector<8x128xf32> to vector<8x32xf32>
    %119 = math.tanh %117 : vector<8x32xf32>
    %120 = arith.mulf %118, %119 : vector<8x32xf32>
    %121 = vector.extract_strided_slice %12 {offsets = [40, 0], sizes = [8, 128], strides = [1, 1]} : vector<64x128xf32> to vector<8x128xf32>
    %122 = arith.truncf %120 : vector<8x32xf32> to vector<8x32xbf16>
    %cst_24 = arith.constant dense<0.000000e+00> : vector<8x128xf32>
    %123 = tpu.matmul %122, %3, %cst_24 {dimension_numbers = #tpu.dot_dimension_numbers<[1], [0], [0], [1], [0, 0, 1, 1], [], []>} : vector<8x32xbf16>, vector<32x128xbf16>, vector<8x128xf32> -> vector<8x128xf32>
    %124 = arith.addf %121, %123 : vector<8x128xf32>
    %125 = math.tanh %124 : vector<8x128xf32>
    %126 = arith.negf %124 : vector<8x128xf32>
    %127 = math.exp %126 : vector<8x128xf32>
    %cst_25 = arith.constant 1.000000e+00 : f32
    %128 = vector.broadcast %cst_25 : f32 to vector<8x128xf32>
    %129 = arith.addf %128, %127 : vector<8x128xf32>
    %130 = arith.divf %128, %129 : vector<8x128xf32>
    %131 = arith.select %18, %125, %130 : vector<8x128xi1>, vector<8x128xf32>
    %132 = vector.extract_strided_slice %131 {offsets = [0, 32], sizes = [8, 32], strides = [1, 1]} : vector<8x128xf32> to vector<8x32xf32>
    %133 = arith.mulf %132, %117 : vector<8x32xf32>
    %134 = vector.extract_strided_slice %131 {offsets = [0, 0], sizes = [8, 32], strides = [1, 1]} : vector<8x128xf32> to vector<8x32xf32>
    %135 = vector.extract_strided_slice %131 {offsets = [0, 64], sizes = [8, 32], strides = [1, 1]} : vector<8x128xf32> to vector<8x32xf32>
    %136 = arith.mulf %134, %135 : vector<8x32xf32>
    %137 = arith.addf %133, %136 : vector<8x32xf32>
    %138 = vector.extract_strided_slice %131 {offsets = [0, 96], sizes = [8, 32], strides = [1, 1]} : vector<8x128xf32> to vector<8x32xf32>
    %139 = math.tanh %137 : vector<8x32xf32>
    %140 = arith.mulf %138, %139 : vector<8x32xf32>
    %141 = vector.extract_strided_slice %12 {offsets = [48, 0], sizes = [8, 128], strides = [1, 1]} : vector<64x128xf32> to vector<8x128xf32>
    %142 = arith.truncf %140 : vector<8x32xf32> to vector<8x32xbf16>
    %cst_26 = arith.constant dense<0.000000e+00> : vector<8x128xf32>
    %143 = tpu.matmul %142, %3, %cst_26 {dimension_numbers = #tpu.dot_dimension_numbers<[1], [0], [0], [1], [0, 0, 1, 1], [], []>} : vector<8x32xbf16>, vector<32x128xbf16>, vector<8x128xf32> -> vector<8x128xf32>
    %144 = arith.addf %141, %143 : vector<8x128xf32>
    %145 = math.tanh %144 : vector<8x128xf32>
    %146 = arith.negf %144 : vector<8x128xf32>
    %147 = math.exp %146 : vector<8x128xf32>
    %cst_27 = arith.constant 1.000000e+00 : f32
    %148 = vector.broadcast %cst_27 : f32 to vector<8x128xf32>
    %149 = arith.addf %148, %147 : vector<8x128xf32>
    %150 = arith.divf %148, %149 : vector<8x128xf32>
    %151 = arith.select %18, %145, %150 : vector<8x128xi1>, vector<8x128xf32>
    %152 = vector.extract_strided_slice %151 {offsets = [0, 32], sizes = [8, 32], strides = [1, 1]} : vector<8x128xf32> to vector<8x32xf32>
    %153 = arith.mulf %152, %137 : vector<8x32xf32>
    %154 = vector.extract_strided_slice %151 {offsets = [0, 0], sizes = [8, 32], strides = [1, 1]} : vector<8x128xf32> to vector<8x32xf32>
    %155 = vector.extract_strided_slice %151 {offsets = [0, 64], sizes = [8, 32], strides = [1, 1]} : vector<8x128xf32> to vector<8x32xf32>
    %156 = arith.mulf %154, %155 : vector<8x32xf32>
    %157 = arith.addf %153, %156 : vector<8x32xf32>
    %158 = vector.extract_strided_slice %151 {offsets = [0, 96], sizes = [8, 32], strides = [1, 1]} : vector<8x128xf32> to vector<8x32xf32>
    %159 = math.tanh %157 : vector<8x32xf32>
    %160 = arith.mulf %158, %159 : vector<8x32xf32>
    %161 = vector.extract_strided_slice %12 {offsets = [56, 0], sizes = [8, 128], strides = [1, 1]} : vector<64x128xf32> to vector<8x128xf32>
    %162 = arith.truncf %160 : vector<8x32xf32> to vector<8x32xbf16>
    %cst_28 = arith.constant dense<0.000000e+00> : vector<8x128xf32>
    %163 = tpu.matmul %162, %3, %cst_28 {dimension_numbers = #tpu.dot_dimension_numbers<[1], [0], [0], [1], [0, 0, 1, 1], [], []>} : vector<8x32xbf16>, vector<32x128xbf16>, vector<8x128xf32> -> vector<8x128xf32>
    %164 = arith.addf %161, %163 : vector<8x128xf32>
    %165 = math.tanh %164 : vector<8x128xf32>
    %166 = arith.negf %164 : vector<8x128xf32>
    %167 = math.exp %166 : vector<8x128xf32>
    %cst_29 = arith.constant 1.000000e+00 : f32
    %168 = vector.broadcast %cst_29 : f32 to vector<8x128xf32>
    %169 = arith.addf %168, %167 : vector<8x128xf32>
    %170 = arith.divf %168, %169 : vector<8x128xf32>
    %171 = arith.select %18, %165, %170 : vector<8x128xi1>, vector<8x128xf32>
    %172 = vector.extract_strided_slice %171 {offsets = [0, 32], sizes = [8, 32], strides = [1, 1]} : vector<8x128xf32> to vector<8x32xf32>
    %173 = arith.mulf %172, %157 : vector<8x32xf32>
    %174 = vector.extract_strided_slice %171 {offsets = [0, 0], sizes = [8, 32], strides = [1, 1]} : vector<8x128xf32> to vector<8x32xf32>
    %175 = vector.extract_strided_slice %171 {offsets = [0, 64], sizes = [8, 32], strides = [1, 1]} : vector<8x128xf32> to vector<8x32xf32>
    %176 = arith.mulf %174, %175 : vector<8x32xf32>
    %177 = arith.addf %173, %176 : vector<8x32xf32>
    %178 = vector.extract_strided_slice %171 {offsets = [0, 96], sizes = [8, 32], strides = [1, 1]} : vector<8x128xf32> to vector<8x32xf32>
    %179 = math.tanh %177 : vector<8x32xf32>
    %180 = arith.mulf %178, %179 : vector<8x32xf32>
    %cst_30 = arith.constant dense<0.000000e+00> : vector<64x128xf32>
    %181 = tpu.matmul %1, %4, %cst_30 {dimension_numbers = #tpu.dot_dimension_numbers<[1], [0], [0], [1], [0, 0, 1, 1], [], []>} : vector<64x128xbf16>, vector<128x128xbf16>, vector<64x128xf32> -> vector<64x128xf32>
    %182 = vector.extract_strided_slice %181 {offsets = [0, 0], sizes = [64, 32], strides = [1, 1]} : vector<64x128xf32> to vector<64x32xf32>
    %c1 = arith.constant 1 : index
    %c0_31 = arith.constant 0 : index
    %183 = vector.load %arg2[%c1, %c0_31] : memref<9x128xf32, #tpu.memory_space<vmem>>, vector<1x32xf32>
    %184 = vector.broadcast %183 : vector<1x32xf32> to vector<64x32xf32>
    %185 = arith.addf %182, %184 : vector<64x32xf32>
    %186 = vector.extract_strided_slice %181 {offsets = [0, 32], sizes = [64, 32], strides = [1, 1]} : vector<64x128xf32> to vector<64x32xf32>
    %187 = arith.truncf %180 : vector<8x32xf32> to vector<8x32xbf16>
    %cst_32 = arith.constant dense<0.000000e+00> : vector<8x128xf32>
    %188 = tpu.matmul %187, %5, %cst_32 {dimension_numbers = #tpu.dot_dimension_numbers<[1], [0], [0], [1], [0, 0, 1, 1], [], []>} : vector<8x32xbf16>, vector<32x128xbf16>, vector<8x128xf32> -> vector<8x128xf32>
    %189 = vector.extract_strided_slice %188 {offsets = [0, 0], sizes = [8, 32], strides = [1, 1]} : vector<8x128xf32> to vector<8x32xf32>
    %190 = vector.extract_strided_slice %188 {offsets = [0, 32], sizes = [8, 32], strides = [1, 1]} : vector<8x128xf32> to vector<8x32xf32>
    %c5 = arith.constant 5 : index
    %c0_33 = arith.constant 0 : index
    %191 = vector.load %arg2[%c5, %c0_33] : memref<9x128xf32, #tpu.memory_space<vmem>>, vector<1x32xf32>
    %192 = vector.broadcast %191 : vector<1x32xf32> to vector<8x32xf32>
    %193 = arith.addf %190, %192 : vector<8x32xf32>
    %cst_34 = arith.constant 0.000000e+00 : f32
    %194 = vector.broadcast %cst_34 : f32 to vector<8x32xf32>
    %195 = arith.maximumf %193, %194 : vector<8x32xf32>
    %196 = vector.shape_cast %186 : vector<64x32xf32> to vector<8x8x32xf32>
    %197 = vector.shape_cast %189 : vector<8x32xf32> to vector<8x1x32xf32>
    %198 = vector.broadcast %197 : vector<8x1x32xf32> to vector<8x8x32xf32>
    %199 = arith.addf %196, %198 : vector<8x8x32xf32>
    %c2 = arith.constant 2 : index
    %c0_35 = arith.constant 0 : index
    %200 = vector.load %arg2[%c2, %c0_35] : memref<9x128xf32, #tpu.memory_space<vmem>>, vector<1x32xf32>
    %201 = vector.shape_cast %200 : vector<1x32xf32> to vector<1x1x32xf32>
    %202 = vector.broadcast %201 : vector<1x1x32xf32> to vector<8x8x32xf32>
    %203 = arith.addf %199, %202 : vector<8x8x32xf32>
    %cst_36 = arith.constant 0.000000e+00 : f32
    %204 = vector.broadcast %cst_36 : f32 to vector<8x8x32xf32>
    %205 = arith.maximumf %203, %204 : vector<8x8x32xf32>
    %c3 = arith.constant 3 : index
    %c0_37 = arith.constant 0 : index
    %206 = vector.load %arg2[%c3, %c0_37] : memref<9x128xf32, #tpu.memory_space<vmem>>, vector<1x32xf32>
    %207 = vector.shape_cast %206 : vector<1x32xf32> to vector<1x1x32xf32>
    %208 = vector.broadcast %207 : vector<1x1x32xf32> to vector<8x8x32xf32>
    %209 = arith.mulf %205, %208 : vector<8x8x32xf32>
    %cst_38 = arith.constant dense<0.000000e+00> : vector<8x8xf32>
    %210 = vector.multi_reduction <add>, %209, %cst_38 [2] : vector<8x8x32xf32> to vector<8x8xf32>
    %c4 = arith.constant 4 : index
    %c0_39 = arith.constant 0 : index
    %211 = vector.load %arg2[%c4, %c0_39] : memref<9x128xf32, #tpu.memory_space<vmem>>, vector<1x1xf32>
    %212 = vector.broadcast %211 : vector<1x1xf32> to vector<8x8xf32>
    %213 = arith.addf %210, %212 : vector<8x8xf32>
    %cst_40 = arith.constant dense<0xFF800000> : vector<8xf32>
    %214 = vector.multi_reduction <maximumf>, %213, %cst_40 [1] : vector<8x8xf32> to vector<8xf32>
    %215 = vector.shape_cast %214 : vector<8xf32> to vector<8x1xf32>
    %216 = vector.broadcast %215 : vector<8x1xf32> to vector<8x8xf32>
    %217 = arith.subf %213, %216 : vector<8x8xf32>
    %218 = math.exp %217 : vector<8x8xf32>
    %cst_41 = arith.constant dense<0.000000e+00> : vector<8xf32>
    %219 = vector.multi_reduction <add>, %218, %cst_41 [1] : vector<8x8xf32> to vector<8xf32>
    %220 = vector.shape_cast %219 : vector<8xf32> to vector<8x1xf32>
    %221 = tpu.reciprocal %220 {approx = true} : vector<8x1xf32> -> vector<8x1xf32>
    %222 = vector.broadcast %221 : vector<8x1xf32> to vector<8x8xf32>
    %223 = arith.mulf %218, %222 : vector<8x8xf32>
    %224 = vector.shape_cast %223 : vector<8x8xf32> to vector<8x8x1xf32>
    %225 = vector.shape_cast %185 : vector<64x32xf32> to vector<8x8x32xf32>
    %226 = vector.broadcast %224 : vector<8x8x1xf32> to vector<8x8x32xf32>
    %227 = arith.mulf %226, %225 : vector<8x8x32xf32>
    %cst_42 = arith.constant dense<0.000000e+00> : vector<8x32xf32>
    %228 = vector.multi_reduction <add>, %227, %cst_42 [1] : vector<8x8x32xf32> to vector<8x32xf32>
    %229 = arith.truncf %228 : vector<8x32xf32> to vector<8x32xbf16>
    %cst_43 = arith.constant dense<0.000000e+00> : vector<8x128xf32>
    %230 = tpu.matmul %229, %6, %cst_43 {dimension_numbers = #tpu.dot_dimension_numbers<[1], [0], [0], [1], [0, 0, 1, 1], [], []>} : vector<8x32xbf16>, vector<32x128xbf16>, vector<8x128xf32> -> vector<8x128xf32>
    %231 = vector.extract_strided_slice %230 {offsets = [0, 0], sizes = [8, 32], strides = [1, 1]} : vector<8x128xf32> to vector<8x32xf32>
    %c6 = arith.constant 6 : index
    %c0_44 = arith.constant 0 : index
    %232 = vector.load %arg2[%c6, %c0_44] : memref<9x128xf32, #tpu.memory_space<vmem>>, vector<1x32xf32>
    %233 = vector.broadcast %232 : vector<1x32xf32> to vector<8x32xf32>
    %234 = arith.addf %231, %233 : vector<8x32xf32>
    %cst_45 = arith.constant 0.000000e+00 : f32
    %235 = vector.broadcast %cst_45 : f32 to vector<8x32xf32>
    %236 = arith.maximumf %234, %235 : vector<8x32xf32>
    %237 = arith.mulf %195, %236 : vector<8x32xf32>
    %238 = arith.truncf %237 : vector<8x32xf32> to vector<8x32xbf16>
    %cst_46 = arith.constant dense<0.000000e+00> : vector<8x128xf32>
    %239 = tpu.matmul %238, %7, %cst_46 {dimension_numbers = #tpu.dot_dimension_numbers<[1], [0], [0], [1], [0, 0, 1, 1], [], []>} : vector<8x32xbf16>, vector<32x128xbf16>, vector<8x128xf32> -> vector<8x128xf32>
    %240 = vector.extract_strided_slice %239 {offsets = [0, 0], sizes = [8, 64], strides = [1, 1]} : vector<8x128xf32> to vector<8x64xf32>
    %c7 = arith.constant 7 : index
    %c0_47 = arith.constant 0 : index
    %241 = vector.load %arg2[%c7, %c0_47] : memref<9x128xf32, #tpu.memory_space<vmem>>, vector<1x64xf32>
    %242 = vector.broadcast %241 : vector<1x64xf32> to vector<8x64xf32>
    %243 = arith.addf %240, %242 : vector<8x64xf32>
    %cst_48 = arith.constant 0.000000e+00 : f32
    %244 = vector.broadcast %cst_48 : f32 to vector<8x64xf32>
    %245 = arith.maximumf %243, %244 : vector<8x64xf32>
    %246 = arith.truncf %245 : vector<8x64xf32> to vector<8x64xbf16>
    %cst_49 = arith.constant dense<0.000000e+00> : vector<8x128xf32>
    %247 = tpu.matmul %246, %8, %cst_49 {dimension_numbers = #tpu.dot_dimension_numbers<[1], [0], [0], [1], [0, 0, 1, 1], [], []>} : vector<8x64xbf16>, vector<64x128xbf16>, vector<8x128xf32> -> vector<8x128xf32>
    %c8 = arith.constant 8 : index
    %c0_50 = arith.constant 0 : index
    %248 = vector.load %arg2[%c8, %c0_50] : memref<9x128xf32, #tpu.memory_space<vmem>>, vector<1x128xf32>
    %249 = vector.broadcast %248 : vector<1x128xf32> to vector<8x128xf32>
    %250 = arith.addf %247, %249 : vector<8x128xf32>
    %c0_51 = arith.constant 0 : index
    %c0_52 = arith.constant 0 : index
    %251 = vector.load %arg3[%c0_51, %c0_52] : memref<8x128xf32, #tpu.memory_space<vmem>>, vector<8x128xf32>
    tpu.vector_store %arg3[%c0_51, %c0_52], %250 {strides = array<i32>} : memref<8x128xf32, #tpu.memory_space<vmem>>, vector<8x128xf32>,
    return
  }
}

</mosaic_0001>

<bundles_post_ra>
// kernel: _net_forward.1
= control target key start
LH: loop header
LB: loop body
LE: loop exit
PB: predicated region body
PF: predicated region fallthrough
CT: control target
= control target key end

     0   :  { %v2271_v1 = vmov 0.0   ;;  %vm2272_vm0 = vmmov 0   ;;  %v2273_v3 = vmov 0   ;;  %v229_v27 = vlaneseq  ;;  %s2274_s11 = smov 64   ;;  %s2275_s12 = smov 32   ;;  %s2775_s1 = inlined_call_operand.vmem [shape: bf16[448,128], index: 1, kind: input, shape index: {}]   ;;  %s2776_s0 = inlined_call_operand.vmem [shape: bf16[128,128], index: 0, kind: input, shape index: {}]   ;;  %s2777_s2 = inlined_call_operand.vmem [shape: f32[9,128], index: 2, kind: input, shape index: {}]   ;;  %s2778_s3 = inlined_call_operand.vmem [shape: f32[8,128], index: 3, kind: output, shape index: {}]  }
   0x1   :  { %v2153_v0 = vld [vmem:[%s2775_s1] sm:$0xff]   ;;  %2018 = vmatprep.subr.bf16.mxu1 %v2271_v1  ;;  %2022 = vmatprep.mubr.msk.bf16.mxu1 %vm2272_vm0, %v2271_v1  ;;  %v2154_v2 = vld [vmem:[%s2775_s1 + $0x8] sm:$0xff]   ;;  %v2155_v4 = vld [vmem:[%s2775_s1 + $0x10] sm:$0xff]   ;;  %vm246_vm4 = vcmask 261120   ;;  %s2277_s22 = smov 96   ;;  %vm1312_vm5 = vcmask 1041409  }
   0x2   :  { %2152 = vset.pattern.permute.xlu1 %v2273_v3  ;;  %2151 = vset.pattern.permute.xlu0 %v2273_v3  ;;  %v2313_v5 = vld [vmem:[%s2775_s1 + $0x40] sm:$0xff]   ;;  %v2156_v6 = vld [vmem:[%s2775_s1 + $0x18] sm:$0xff]   ;;  %v2322_v7 = vld [vmem:[%s2775_s1 + $0x48] sm:$0xff]   ;;  %v2367_v29 = vand.u32 127, %v229_v27  ;;  %vm1314_vm6 = vcmask 1042434   ;;  %vm1316_vm7 = vcmask 1043459  }
   0x3   :  { %1994 = vmatprep.subr.bf16.mxu0 %v2153_v0  ;;  %2019 = vmatpush3.bf16.msra.mxu1 %v2313_v5  ;;  %v2163_v8 = vld [vmem:[%s2776_s0] sm:$0xff]   ;;  %v2158_v10 = vld [vmem:[%s2775_s1 + $0x28] sm:$0xff]   ;;  %v2159_v11 = vld [vmem:[%s2775_s1 + $0x30] sm:$0xff]   ;;  %vm1318_vm8 = vcmask 1044484   ;;  %vm1320_vm9 = vcmask 1045509   ;;  %vm1322_vm10 = vcmask 1046534  }
   0x4   :  { %1995 = vmatpush3.bf16.msra.mxu0 %v2153_v0  ;;  %2020 = vmatprep.subr.bf16.mxu1 %v2271_v1  ;;  %v2157_v9 = vld [vmem:[%s2775_s1 + $0x20] sm:$0xff]   ;;  %v2161_v12 = vld [vmem:[%s2775_s1 + $0x38] sm:$0xff]   ;;  %v2164_v13 = vld [vmem:[%s2776_s0 + $0x8] sm:$0xff]   ;;  %vm231_vm1 = vcmp.ge.s32.totalorder %v2367_v29, 64  ;;  %vm232_vm2 = vcmp.lt.s32.totalorder %v2367_v29, 96  ;;  %vm1324_vm11 = vcmask 1047559  }
   0x5   :  { %1996 = vmatprep.subr.bf16.mxu0 %v2154_v2  ;;  %2010 = vmatprep.mubr.bf16.mxu0 %v2163_v8  ;;  %v2359_v18 = vld [vmem:[%s2777_s2] ss:$0 sm:$0xff]  ;;  %vm2371_vm3 = vmand %vm231_vm1, %vm232_vm2  ;;  %v2168_v30 = vld [vmem:[%s2775_s1 + $0x98] sm:$0xff]   ;;  %vm1327_vm12 = vcmask 64512   ;;  %vm1820_vm13 = vcmask 523264  }
   0x7   :  { %2021 = vmatpush3.bf16.msra.mxu1 %v2322_v7 }
   0x8   :  { %1997 = vmatpush3.bf16.msra.mxu0 %v2154_v2  ;;  %2026 = vmatprep.subr.bf16.mxu1 %v2271_v1 }
   0x9   :  { %1998 = vmatprep.subr.bf16.mxu0 %v2155_v4 }
   0xa   :  { %2023 = vmatmul.mubr.bf16.vlgmr.msra.gmra.mrb[0].mxu1 %v2273_v3 }
   0xb   :  { %2027 = vmatpush3.bf16.msra.mxu1 %v2313_v5  ;;  %2030 = vmatprep.mubr.msk.bf16.mxu1 %vm2272_vm0, %v2271_v1 }
   0xc   :  { %1999 = vmatpush3.bf16.msra.mxu0 %v2155_v4  ;;  %2028 = vmatprep.subr.bf16.mxu1 %v2271_v1 }
   0xd   :  { %2000 = vmatprep.subr.bf16.mxu0 %v2156_v6 }
   0xf   :  { %2029 = vmatpush3.bf16.msra.mxu1 %v2322_v7 }
  0x10   :  { %2001 = vmatpush3.bf16.msra.mxu0 %v2156_v6  ;;  %2034 = vmatprep.subr.bf16.mxu1 %v2271_v1 }
  0x11   :  { %2002 = vmatprep.subr.bf16.mxu0 %v2157_v9 }
  0x14   :  { %2003 = vmatpush3.bf16.msra.mxu0 %v2157_v9 }
  0x15   :  { %2004 = vmatprep.subr.bf16.mxu0 %v2158_v10 }
  0x18   :  { %2005 = vmatpush3.bf16.msra.mxu0 %v2158_v10 }
  0x19   :  { %2006 = vmatprep.subr.bf16.mxu0 %v2159_v11 }
  0x1c   :  { %2007 = vmatpush3.bf16.msra.mxu0 %v2159_v11 }
  0x1d   :  { %2008 = vmatprep.subr.bf16.mxu0 %v2161_v12 }
  0x20   :  { %2009 = vmatpush3.bf16.msra.mxu0 %v2161_v12 }
  0x21   :  { %2058 = vmatprep.subr.bf16.mxu0 %v2271_v1 }
  0x23   :  { %2011 = vmatmul.mubr.bf16.vlgmr.msra.gmra.mrb[0].mxu0 %v2164_v13 }
  0x24   :  { %2059 = vmatpush3.bf16.msra.mxu0 %v2313_v5 }
  0x25   :  { %2060 = vmatprep.subr.bf16.mxu0 %v2271_v1 }
  0x28   :  { %2061 = vmatpush3.bf16.msra.mxu0 %v2322_v7 }
  0x29   :  { %2074 = vmatprep.subr.bf16.mxu0 %v2271_v1 }
  0xdd   :  { %v284_v14 = vpop.f32.mrb[0].mxu1 }
  0xde   :  { %v2024_v15 = vpop.f32.mrb[1].mxu1 }
  0xdf   :  { %v287_v16 = vpop.f32.mrb[2].mxu1 }
  0xe0   :  { %v2025_v17 = vpop.f32.mrb[3].mxu1 }
  0xf6   :  { %v2361_v19 = vpop.f32.mrb[0].mxu0 }
  0xf7   :  { %v198_v20 = vpop.f32.mrb[1].mxu0  ;;  %v207_v3 = vadd.f32 %v2361_v19, %v2359_v18 }
  0xf8   :  { %v199_v21 = vadd.f32 %v2359_v18, %v198_v20  ;;  %v2364_v22 = vpop.f32.mrb[2].mxu0 }
  0xf9   :  { %v201_v23 = vpop.f32.mrb[3].mxu0 }
  0xfa   :  { %v290_v24 = vadd.f32 %v284_v14, %v199_v21  ;;  %v202_v44 = vadd.f32 %v2359_v18, %v201_v23 }
  0xfc   :  { %v1884_v25 = vmul.f32 -1.442695, %v290_v24 }
  0xfe   :  { %2189 = vpow2.f32 %v1884_v25 }
  0xff   :  { %2191 = vtanh.f32 %v290_v24 }
 0x108   :  { %v2190_v26 = vpop.eup %2189 }
 0x109   :  { %v295_v28 = vadd.f32 1.0, %v2190_v26  ;;  %v2192_v31 = vpop.eup %2191 }
 0x10b   :  { %2193 = vrcp.f32 %v295_v28 }
 0x115   :  { %v2194_v32 = vpop.eup %2193 }
 0x116   :  { %v298_v33 = vsel %vm2371_vm3, %v2192_v31, %v2194_v32  ;;  %v210_v32 = vadd.f32 %v2364_v22, %v2359_v18 }
 0x117   :  { %301 = vrot.lane.b32.xlu0 %v298_v33, %s2274_s11  ;;  %v299_v36 = vmul.f32 0.0, %v298_v33 }
 0x189   :  { %v302_v34 = vpop.permute.xlu0 %301 }
 0x18a   :  { %v304_v35 = vmul.f32 %v302_v34, %v298_v33 }
 0x18c   :  { %306 = vrot.lane.b32.xlu0 %v304_v35, %s2275_s12 }
 0x1fe   :  { %v307_v37 = vpop.permute.xlu0 %306 }
 0x1ff   :  { %v309_v38 = vadd.f32 %v307_v37, %v299_v36 }
 0x201   :  { %2195 = vtanh.f32 %v309_v38 }
 0x20b   :  { %v2196_v39 = vpop.eup %2195 }
 0x20c   :  { %312 = vrot.lane.b32.xlu1 %v2196_v39, %s2274_s11 }
 0x27e   :  { %v313_v40 = vpop.permute.xlu1 %312 }
 0x27f   :  { %v315_v41 = vmul.f32 %v313_v40, %v298_v33 }
 0x281   :  { %v316_v42 = vpack.c.bf16 %v315_v41, %v315_v41 }
 0x283   :  { %318 = vrot.lane.b32.xlu1 %v316_v42, %s2275_s12 }
 0x2f5   :  { %v319_v43 = vpop.permute.xlu1 %318 }
 0x2f6   :  { %2031 = vmatmul.mubr.msk.bf16.vlgmr.msra.gmra.mrb[4].mxu1 %vm246_vm4, %v319_v43 }
 0x2f7   :  { %2035 = vmatpush3.bf16.msra.mxu1 %v2313_v5  ;;  %2038 = vmatprep.mubr.msk.bf16.mxu1 %vm2272_vm0, %v2271_v1 }
 0x2f8   :  { %2036 = vmatprep.subr.bf16.mxu1 %v2271_v1 }
 0x2fb   :  { %2037 = vmatpush3.bf16.msra.mxu1 %v2322_v7 }
 0x2fc   :  { %2042 = vmatprep.subr.bf16.mxu1 %v2271_v1 }
 0x3c9   :  { %v357_v45 = vpop.f32.mrb[4].mxu1 }
 0x3ca   :  { %v363_v46 = vadd.f32 %v357_v45, %v202_v44  ;;  %v2032_v47 = vpop.f32.mrb[5].mxu1 }
 0x3cb   :  { %v360_v48 = vpop.f32.mrb[6].mxu1 }
 0x3cc   :  { %v1886_v49 = vmul.f32 -1.442695, %v363_v46  ;;  %v2033_v50 = vpop.f32.mrb[7].mxu1  ;;  %v2165_v48 = vld [vmem:[%s2776_s0 + $0x10] sm:$0xff]  }
 0x3cd   :  { %2014 = vmatprep.mubr.bf16.mxu0 %v2165_v48 }
 0x3ce   :  { %2197 = vpow2.f32 %v1886_v49  ;;  %v2166_v49 = vld [vmem:[%s2776_s0 + $0x18] sm:$0xff]  }
 0x3cf   :  { %2199 = vtanh.f32 %v363_v46  ;;  %2015 = vmatmul.mubr.bf16.gmra.mrb[4].mxu0 %v2166_v49 }
 0x3d0   :  { %2062 = vmatprep.mubr.msk.bf16.mxu0 %vm2272_vm0, %v2271_v1 }
 0x3d8   :  { %v2198_v51 = vpop.eup %2197 }
 0x3d9   :  { %v368_v52 = vadd.f32 1.0, %v2198_v51  ;;  %v2200_v53 = vpop.eup %2199 }
 0x3db   :  { %2201 = vrcp.f32 %v368_v52 }
 0x3e5   :  { %v2202_v54 = vpop.eup %2201 }
 0x3e6   :  { %v371_v55 = vsel %vm2371_vm3, %v2200_v53, %v2202_v54 }
 0x3e7   :  { %374 = vrot.lane.b32.xlu0 %v371_v55, %s2274_s11  ;;  %v372_v58 = vmul.f32 %v371_v55, %v309_v38 }
 0x459   :  { %v375_v56 = vpop.permute.xlu0 %374 }
 0x45a   :  { %v377_v57 = vmul.f32 %v375_v56, %v371_v55 }
 0x45c   :  { %379 = vrot.lane.b32.xlu1 %v377_v57, %s2275_s12 }
 0x4a2   :  { %v2433_v54 = vpop.f32.mrb[4].mxu0 }
 0x4ce   :  { %v380_v59 = vpop.permute.xlu1 %379 }
 0x4cf   :  { %v382_v60 = vadd.f32 %v380_v59, %v372_v58 }
 0x4d1   :  { %2203 = vtanh.f32 %v382_v60 }
 0x4db   :  { %v2204_v61 = vpop.eup %2203 }
 0x4dc   :  { %385 = vrot.lane.b32.xlu0 %v2204_v61, %s2274_s11 }
 0x54e   :  { %v386_v62 = vpop.permute.xlu0 %385 }
 0x54f   :  { %v388_v63 = vmul.f32 %v386_v62, %v371_v55  ;;  %v214_v55 = vpop.f32.mrb[5].mxu0 }
 0x550   :  { %v2435_v56 = vpop.f32.mrb[6].mxu0  ;;  %v215_v59 = vadd.f32 %v2359_v18, %v214_v55 }
 0x551   :  { %v389_v0 = vpack.c.bf16 %v388_v63, %v388_v63  ;;  %v217_v57 = vpop.f32.mrb[7].mxu0 }
 0x553   :  { %391 = vrot.lane.b32.xlu1 %v389_v0, %s2275_s12 }
 0x5c5   :  { %v392_v2 = vpop.permute.xlu1 %391 }
 0x5c6   :  { %2039 = vmatmul.mubr.msk.bf16.vlgmr.msra.gmra.mrb[8].mxu1 %vm246_vm4, %v392_v2 }
 0x5c7   :  { %2043 = vmatpush3.bf16.msra.mxu1 %v2313_v5  ;;  %2046 = vmatprep.mubr.msk.bf16.mxu1 %vm2272_vm0, %v2271_v1 }
 0x5c8   :  { %2044 = vmatprep.subr.bf16.mxu1 %v2271_v1 }
 0x5cb   :  { %2045 = vmatpush3.bf16.msra.mxu1 %v2322_v7 }
 0x5cc   :  { %2050 = vmatprep.subr.bf16.mxu1 %v2271_v1 }
 0x699   :  { %v430_v4 = vpop.f32.mrb[8].mxu1 }
 0x69a   :  { %v436_v6 = vadd.f32 %v430_v4, %v207_v3  ;;  %v2040_v8 = vpop.f32.mrb[9].mxu1 }
 0x69b   :  { %v433_v9 = vpop.f32.mrb[10].mxu1 }
 0x69c   :  { %v1888_v10 = vmul.f32 -1.442695, %v436_v6  ;;  %v2041_v11 = vpop.f32.mrb[11].mxu1 }
 0x69e   :  { %2205 = vpow2.f32 %v1888_v10 }
 0x69f   :  { %2207 = vtanh.f32 %v436_v6 }
 0x6a8   :  { %v2206_v12 = vpop.eup %2205 }
 0x6a9   :  { %v441_v13 = vadd.f32 1.0, %v2206_v12  ;;  %v2208_v14 = vpop.eup %2207 }
 0x6ab   :  { %2209 = vrcp.f32 %v441_v13 }
 0x6b5   :  { %v2210_v15 = vpop.eup %2209 }
 0x6b6   :  { %v444_v16 = vsel %vm2371_vm3, %v2208_v14, %v2210_v15 }
 0x6b7   :  { %447 = vrot.lane.b32.xlu0 %v444_v16, %s2274_s11  ;;  %v445_v20 = vmul.f32 %v444_v16, %v382_v60 }
 0x729   :  { %v448_v17 = vpop.permute.xlu0 %447 }
 0x72a   :  { %v450_v19 = vmul.f32 %v448_v17, %v444_v16 }
 0x72c   :  { %452 = vrot.lane.b32.xlu1 %v450_v19, %s2275_s12 }
 0x79e   :  { %v453_v21 = vpop.permute.xlu1 %452 }
 0x79f   :  { %v455_v23 = vadd.f32 %v453_v21, %v445_v20  ;;  %v218_v21 = vadd.f32 %v2359_v18, %v217_v57 }
 0x7a1   :  { %2211 = vtanh.f32 %v455_v23 }
 0x7ab   :  { %v2212_v24 = vpop.eup %2211 }
 0x7ac   :  { %458 = vrot.lane.b32.xlu0 %v2212_v24, %s2274_s11 }
 0x81e   :  { %v459_v25 = vpop.permute.xlu0 %458 }
 0x81f   :  { %v461_v26 = vmul.f32 %v459_v25, %v444_v16 }
 0x821   :  { %v462_v28 = vpack.c.bf16 %v461_v26, %v461_v26 }
 0x823   :  { %464 = vrot.lane.b32.xlu1 %v462_v28, %s2275_s12 }
 0x895   :  { %v465_v31 = vpop.permute.xlu1 %464 }
 0x896   :  { %2047 = vmatmul.mubr.msk.bf16.vlgmr.msra.gmra.mrb[12].mxu1 %vm246_vm4, %v465_v31 }
 0x897   :  { %2051 = vmatpush3.bf16.msra.mxu1 %v2313_v5  ;;  %2054 = vmatprep.mubr.msk.bf16.mxu1 %vm2272_vm0, %v2271_v1 }
 0x898   :  { %2052 = vmatprep.subr.bf16.mxu1 %v2271_v1 }
 0x89b   :  { %2053 = vmatpush3.bf16.msra.mxu1 %v2322_v7 }
 0x89c   :  { %2066 = vmatprep.subr.bf16.mxu1 %v2271_v1 }
 0x969   :  { %v503_v33 = vpop.f32.mrb[12].mxu1 }
 0x96a   :  { %v509_v34 = vadd.f32 %v503_v33, %v210_v32  ;;  %v2048_v35 = vpop.f32.mrb[13].mxu1 }
 0x96b   :  { %v506_v36 = vpop.f32.mrb[14].mxu1 }
 0x96c   :  { %v1890_v37 = vmul.f32 -1.442695, %v509_v34  ;;  %v2049_v38 = vpop.f32.mrb[15].mxu1 }
 0x96e   :  { %2213 = vpow2.f32 %v1890_v37 }
 0x96f   :  { %2215 = vtanh.f32 %v509_v34 }
 0x978   :  { %v2214_v39 = vpop.eup %2213 }
 0x979   :  { %v514_v40 = vadd.f32 1.0, %v2214_v39  ;;  %v2216_v41 = vpop.eup %2215 }
 0x97b   :  { %2217 = vrcp.f32 %v514_v40 }
 0x985   :  { %v2218_v42 = vpop.eup %2217 }
 0x986   :  { %v517_v43 = vsel %vm2371_vm3, %v2216_v41, %v2218_v42 }
 0x987   :  { %520 = vrot.lane.b32.xlu0 %v517_v43, %s2274_s11  ;;  %v518_v45 = vmul.f32 %v517_v43, %v455_v23 }
 0x9f9   :  { %v521_v44 = vpop.permute.xlu0 %520 }
 0x9fa   :  { %v523_v22 = vmul.f32 %v521_v44, %v517_v43 }
 0x9fc   :  { %525 = vrot.lane.b32.xlu1 %v523_v22, %s2275_s12  ;;  %v223_v22 = vadd.f32 %v2433_v54, %v2359_v18 }
 0xa6e   :  { %v526_v46 = vpop.permute.xlu1 %525 }
 0xa6f   :  { %v528_v47 = vadd.f32 %v526_v46, %v518_v45 }
 0xa71   :  { %2219 = vtanh.f32 %v528_v47 }
 0xa7b   :  { %v2220_v50 = vpop.eup %2219 }
 0xa7c   :  { %531 = vrot.lane.b32.xlu0 %v2220_v50, %s2274_s11 }
 0xaee   :  { %v532_v51 = vpop.permute.xlu0 %531 }
 0xaef   :  { %v534_v52 = vmul.f32 %v532_v51, %v517_v43 }
 0xaf1   :  { %v535_v53 = vpack.c.bf16 %v534_v52, %v534_v52 }
 0xaf3   :  { %537 = vrot.lane.b32.xlu1 %v535_v53, %s2275_s12 }
 0xb65   :  { %v538_v58 = vpop.permute.xlu1 %537 }
 0xb66   :  { %2055 = vmatmul.mubr.msk.bf16.vlgmr.msra.gmra.mrb[16].mxu1 %vm246_vm4, %v538_v58 }
 0xb67   :  { %2067 = vmatpush3.bf16.msra.mxu1 %v2313_v5  ;;  %2070 = vmatprep.mubr.msk.bf16.mxu1 %vm2272_vm0, %v2271_v1 }
 0xb68   :  { %2068 = vmatprep.subr.bf16.mxu1 %v2271_v1 }
 0xb6b   :  { %2069 = vmatpush3.bf16.msra.mxu1 %v2322_v7 }
 0xc39   :  { %v576_v60 = vpop.f32.mrb[16].mxu1 }
 0xc3a   :  { %v582_v61 = vadd.f32 %v576_v60, %v215_v59  ;;  %v2056_v62 = vpop.f32.mrb[17].mxu1 }
 0xc3b   :  { %v579_v63 = vpop.f32.mrb[18].mxu1 }
 0xc3c   :  { %v1892_v0 = vmul.f32 -1.442695, %v582_v61  ;;  %v2057_v2 = vpop.f32.mrb[19].mxu1 }
 0xc3e   :  { %2221 = vpow2.f32 %v1892_v0 }
 0xc3f   :  { %2223 = vtanh.f32 %v582_v61 }
 0xc48   :  { %v2222_v3 = vpop.eup %2221 }
 0xc49   :  { %v587_v4 = vadd.f32 1.0, %v2222_v3  ;;  %v2224_v6 = vpop.eup %2223 }
 0xc4b   :  { %2225 = vrcp.f32 %v587_v4  ;;  %v226_v4 = vadd.f32 %v2435_v56, %v2359_v18 }
 0xc55   :  { %v2226_v8 = vpop.eup %2225 }
 0xc56   :  { %v590_v9 = vsel %vm2371_vm3, %v2224_v6, %v2226_v8 }
 0xc57   :  { %593 = vrot.lane.b32.xlu0 %v590_v9, %s2274_s11  ;;  %v591_v12 = vmul.f32 %v590_v9, %v528_v47 }
 0xcc9   :  { %v594_v10 = vpop.permute.xlu0 %593 }
 0xcca   :  { %v596_v11 = vmul.f32 %v594_v10, %v590_v9 }
 0xccc   :  { %598 = vrot.lane.b32.xlu1 %v596_v11, %s2275_s12 }
 0xd3e   :  { %v599_v13 = vpop.permute.xlu1 %598 }
 0xd3f   :  { %v601_v14 = vadd.f32 %v599_v13, %v591_v12 }
 0xd41   :  { %2227 = vtanh.f32 %v601_v14 }
 0xd4b   :  { %v2228_v15 = vpop.eup %2227 }
 0xd4c   :  { %604 = vrot.lane.b32.xlu0 %v2228_v15, %s2274_s11 }
 0xdbe   :  { %v605_v16 = vpop.permute.xlu0 %604 }
 0xdbf   :  { %v607_v17 = vmul.f32 %v605_v16, %v590_v9 }
 0xdc1   :  { %v608_v19 = vpack.c.bf16 %v607_v17, %v607_v17 }
 0xdc3   :  { %610 = vrot.lane.b32.xlu1 %v608_v19, %s2275_s12 }
 0xe35   :  { %v611_v20 = vpop.permute.xlu1 %610 }
 0xe36   :  { %2063 = vmatmul.mubr.msk.bf16.vlgmr.msra.gmra.mrb[8].mxu0 %vm246_vm4, %v611_v20 }
 0xe37   :  { %2075 = vmatpush3.bf16.msra.mxu0 %v2313_v5  ;;  %2078 = vmatprep.mubr.msk.bf16.mxu0 %vm2272_vm0, %v2271_v1 }
 0xe38   :  { %2076 = vmatprep.subr.bf16.mxu0 %v2271_v1 }
 0xe3b   :  { %2077 = vmatpush3.bf16.msra.mxu0 %v2322_v7 }
 0xe3c   :  { %2106 = vmatprep.subr.bf16.mxu0 %v2271_v1 }
 0xf09   :  { %v649_v23 = vpop.f32.mrb[8].mxu0 }
 0xf0a   :  { %v655_v24 = vadd.f32 %v649_v23, %v218_v21  ;;  %v2064_v25 = vpop.f32.mrb[9].mxu0  ;;  %v2167_v23 = vld [vmem:[%s2775_s1 + $0x90] sm:$0xff]  }
 0xf0b   :  { %v652_v26 = vpop.f32.mrb[10].mxu0  ;;  %v2169_v25 = vld [vmem:[%s2775_s1 + $0x50] sm:$0xff]  }
 0xf0c   :  { %v1894_v28 = vmul.f32 -1.442695, %v655_v24  ;;  %v2065_v31 = vpop.f32.mrb[11].mxu0  ;;  %v2170_v26 = vld [vmem:[%s2775_s1 + $0x58] sm:$0xff]   ;;  %2082 = vmatprep.subr.bf16.mxu1 %v2169_v25 }
 0xf0d   :  { %v2171_v31 = vld [vmem:[%s2775_s1 + $0x60] sm:$0xff]  }
 0xf0e   :  { %2229 = vpow2.f32 %v1894_v28  ;;  %v2177_v28 = vld [vmem:[%s2776_s0 + $0x20] sm:$0xff]  }
 0xf0f   :  { %2231 = vtanh.f32 %v655_v24 }
 0xf18   :  { %v2230_v32 = vpop.eup %2229 }
 0xf19   :  { %v660_v5 = vadd.f32 1.0, %v2230_v32  ;;  %v2232_v33 = vpop.eup %2231 }
 0xf1b   :  { %2233 = vrcp.f32 %v660_v5  ;;  %v2172_v5 = vld [vmem:[%s2775_s1 + $0x68] sm:$0xff]  }
 0xf25   :  { %v2234_v34 = vpop.eup %2233 }
 0xf26   :  { %v663_v7 = vsel %vm2371_vm3, %v2232_v33, %v2234_v34 }
 0xf27   :  { %666 = vrot.lane.b32.xlu0 %v663_v7, %s2274_s11  ;;  %v664_v37 = vmul.f32 %v663_v7, %v601_v14 }
 0xf99   :  { %v667_v35 = vpop.permute.xlu0 %666 }
 0xf9a   :  { %v669_v36 = vmul.f32 %v667_v35, %v663_v7  ;;  %v2174_v35 = vld [vmem:[%s2775_s1 + $0x78] sm:$0xff]  }
 0xf9c   :  { %671 = vrot.lane.b32.xlu1 %v669_v36, %s2275_s12  ;;  %v2175_v36 = vld [vmem:[%s2775_s1 + $0x80] sm:$0xff]  }
0x100e   :  { %v672_v38 = vpop.permute.xlu1 %671 }
0x100f   :  { %v674_v39 = vadd.f32 %v672_v38, %v664_v37  ;;  %v2176_v37 = vld [vmem:[%s2775_s1 + $0x88] sm:$0xff]  }
0x1010   :  { %v2178_v38 = vld [vmem:[%s2776_s0 + $0x28] sm:$0xff]  }
0x1011   :  { %2235 = vtanh.f32 %v674_v39 }
0x101b   :  { %v2236_v40 = vpop.eup %2235 }
0x101c   :  { %677 = vrot.lane.b32.xlu0 %v2236_v40, %s2274_s11  ;;  %v2180_v40 = vld [vmem:[%s2776_s0 + $0x38] sm:$0xff]  }
0x108e   :  { %v678_v41 = vpop.permute.xlu0 %677 }
0x108f   :  { %v680_v42 = vmul.f32 %v678_v41, %v663_v7  ;;  %v2173_v7 = vld [vmem:[%s2775_s1 + $0x70] sm:$0xff]  }
0x1091   :  { %v681_v43 = vpack.c.bf16 %v680_v42, %v680_v42  ;;  %v1916_v42 = vld [vmem:[%s2777_s2 + $0x2] ss:$0 sm:$0xff] }
0x1093   :  { %683 = vrot.lane.b32.xlu1 %v681_v43, %s2275_s12 }
0x1105   :  { %v684_v44 = vpop.permute.xlu1 %683 }
0x1106   :  { %2071 = vmatmul.mubr.msk.bf16.vlgmr.msra.gmra.mrb[20].mxu1 %vm246_vm4, %v684_v44  ;;  %v2276_v44 = vmov 1966171168  }
0x1107   :  { %2083 = vmatpush3.bf16.msra.mxu1 %v2169_v25  ;;  %2098 = vmatprep.mubr.bf16.mxu1 %v2177_v28 }
0x1108   :  { %2084 = vmatprep.subr.bf16.mxu1 %v2170_v26 }
0x110b   :  { %2085 = vmatpush3.bf16.msra.mxu1 %v2170_v26 }
0x110c   :  { %2086 = vmatprep.subr.bf16.mxu1 %v2171_v31 }
0x110f   :  { %2087 = vmatpush3.bf16.msra.mxu1 %v2171_v31 }
0x1110   :  { %2088 = vmatprep.subr.bf16.mxu1 %v2172_v5 }
0x1113   :  { %2089 = vmatpush3.bf16.msra.mxu1 %v2172_v5 }
0x1114   :  { %2090 = vmatprep.subr.bf16.mxu1 %v2173_v7 }
0x1117   :  { %2091 = vmatpush3.bf16.msra.mxu1 %v2173_v7 }
0x1118   :  { %2092 = vmatprep.subr.bf16.mxu1 %v2174_v35 }
0x111b   :  { %2093 = vmatpush3.bf16.msra.mxu1 %v2174_v35 }
0x111c   :  { %2094 = vmatprep.subr.bf16.mxu1 %v2175_v36 }
0x111f   :  { %2095 = vmatpush3.bf16.msra.mxu1 %v2175_v36 }
0x1120   :  { %2096 = vmatprep.subr.bf16.mxu1 %v2176_v37 }
0x1123   :  { %2097 = vmatpush3.bf16.msra.mxu1 %v2176_v37 }
0x1126   :  { %2099 = vmatmul.mubr.bf16.vlgmr.msra.gmra.mrb[24].mxu1 %v2178_v38 }
0x11d9   :  { %v722_v45 = vpop.f32.mrb[20].mxu1 }
0x11da   :  { %v728_v46 = vadd.f32 %v722_v45, %v223_v22  ;;  %v2072_v47 = vpop.f32.mrb[21].mxu1  ;;  %v1050_v22 = vunpack.c.l.s4 %v2276_v44  ;;  %v2538_v45 = vshrl.u32 %v229_v27, 7 }
0x11db   :  { %v725_v48 = vpop.f32.mrb[22].mxu1 }
0x11dc   :  { %v1896_v49 = vmul.f32 -1.442695, %v728_v46  ;;  %v2073_v50 = vpop.f32.mrb[23].mxu1 }
0x11de   :  { %2237 = vpow2.f32 %v1896_v49 }
0x11df   :  { %2239 = vtanh.f32 %v728_v46  ;;  %v1051_v46 = vunpack.c.0.s8 %v1050_v22 }
0x11e1   :  { %v1054_v50 = vsub.s32 %v1051_v46, %v2538_v45 }
0x11e8   :  { %v2238_v51 = vpop.eup %2237 }
0x11e9   :  { %v733_v52 = vadd.f32 1.0, %v2238_v51  ;;  %v2240_v53 = vpop.eup %2239 }
0x11eb   :  { %2241 = vrcp.f32 %v733_v52 }
0x11f5   :  { %v2242_v55 = vpop.eup %2241 }
0x11f6   :  { %v736_v57 = vsel %vm2371_vm3, %v2240_v53, %v2242_v55 }
0x11f7   :  { %739 = vrot.lane.b32.xlu0 %v736_v57, %s2274_s11  ;;  %v737_v59 = vmul.f32 %v736_v57, %v674_v39  ;;  %v2179_v39 = vld [vmem:[%s2776_s0 + $0x30] sm:$0xff]  }
0x11f8   :  { %2102 = vmatprep.mubr.bf16.mxu1 %v2179_v39 }
0x11f9   :  { %2103 = vmatmul.mubr.bf16.gmra.mrb[28].mxu1 %v2180_v40  ;;  %v2535_v43 = vpop.f32.mrb[24].mxu1 }
0x11fa   :  { %v2540_v47 = vpop.f32.mrb[25].mxu1 }
0x11fb   :  { %v2542_v48 = vpop.f32.mrb[26].mxu1 }
0x11fc   :  { %v2544_v49 = vpop.f32.mrb[27].mxu1 }
0x1269   :  { %v740_v58 = vpop.permute.xlu0 %739 }
0x126a   :  { %v742_v54 = vmul.f32 %v740_v58, %v736_v57  ;;  %v2557_v58 = vsub.s32 0, %v2538_v45 }
0x126c   :  { %744 = vrot.lane.b32.xlu1 %v742_v54, %s2275_s12 }
0x12cc   :  { %v2547_v51 = vpop.f32.mrb[28].mxu1 }
0x12cd   :  { %v2551_v53 = vpop.f32.mrb[29].mxu1 }
0x12ce   :  { %v2559_v54 = vpop.f32.mrb[30].mxu1 }
0x12de   :  { %v745_v60 = vpop.permute.xlu1 %744 }
0x12df   :  { %v747_v61 = vadd.f32 %v745_v60, %v737_v59  ;;  %v2561_v60 = vpop.f32.mrb[31].mxu1 }
0x12e1   :  { %2243 = vtanh.f32 %v747_v61 }
0x12eb   :  { %v2244_v62 = vpop.eup %2243 }
0x12ec   :  { %750 = vrot.lane.b32.xlu0 %v2244_v62, %s2274_s11 }
0x135e   :  { %v751_v63 = vpop.permute.xlu0 %750 }
0x135f   :  { %v753_v0 = vmul.f32 %v751_v63, %v736_v57 }
0x1361   :  { %v754_v2 = vpack.c.bf16 %v753_v0, %v753_v0 }
0x1363   :  { %756 = vrot.lane.b32.xlu1 %v754_v2, %s2275_s12 }
0x13d5   :  { %v757_v3 = vpop.permute.xlu1 %756 }
0x13d6   :  { %2079 = vmatmul.mubr.msk.bf16.vlgmr.msra.gmra.mrb[12].mxu0 %vm246_vm4, %v757_v3 }
0x13d7   :  { %2110 = vmatprep.mubr.msk.bf16.mxu0 %vm2272_vm0, %v2271_v1  ;;  %2107 = vmatpush3.bf16.msra.mxu0 %v2167_v23 }
0x13d8   :  { %2108 = vmatprep.subr.bf16.mxu0 %v2271_v1 }
0x13db   :  { %2109 = vmatpush3.bf16.msra.mxu0 %v2168_v30 }
0x13dc   :  { %2114 = vmatprep.subr.bf16.mxu0 %v2271_v1 }
0x14a9   :  { %v795_v6 = vpop.f32.mrb[12].mxu0 }
0x14aa   :  { %v801_v8 = vadd.f32 %v795_v6, %v226_v4  ;;  %v2080_v9 = vpop.f32.mrb[13].mxu0 }
0x14ab   :  { %v798_v10 = vpop.f32.mrb[14].mxu0 }
0x14ac   :  { %v1898_v11 = vmul.f32 -1.442695, %v801_v8  ;;  %v2081_v12 = vpop.f32.mrb[15].mxu0 }
0x14ae   :  { %2245 = vpow2.f32 %v1898_v11 }
0x14af   :  { %2247 = vtanh.f32 %v801_v8 }
0x14b8   :  { %v2246_v13 = vpop.eup %2245 }
0x14b9   :  { %v806_v14 = vadd.f32 1.0, %v2246_v13  ;;  %v2248_v15 = vpop.eup %2247 }
0x14bb   :  { %2249 = vrcp.f32 %v806_v14 }
0x14c5   :  { %v2250_v16 = vpop.eup %2249 }
0x14c6   :  { %v809_v17 = vsel %vm2371_vm3, %v2248_v15, %v2250_v16 }
0x14c7   :  { %812 = vrot.lane.b32.xlu0 %v809_v17, %s2274_s11  ;;  %v810_v56 = vmul.f32 %v809_v17, %v747_v61 }
0x1539   :  { %v813_v19 = vpop.permute.xlu0 %812 }
0x153a   :  { %v815_v18 = vmul.f32 %v813_v19, %v809_v17 }
0x153c   :  { %817 = vrot.lane.b32.xlu1 %v815_v18, %s2275_s12 }
0x15ae   :  { %v818_v20 = vpop.permute.xlu1 %817 }
0x15af   :  { %v820_v21 = vadd.f32 %v818_v20, %v810_v56  ;;  %v1917_v56 = vld [vmem:[%s2777_s2 + $0x3] ss:$0 sm:$0xff] }
0x15b1   :  { %2251 = vtanh.f32 %v820_v21 }
0x15bb   :  { %v2252_v24 = vpop.eup %2251 }
0x15bc   :  { %823 = vrot.lane.b32.xlu0 %v2252_v24, %s2274_s11 }
0x15c0   :  { %1167 = vrot.lane.b32.xlu0 %v1916_v42, %s2275_s12 }
0x162e   :  { %v824_v32 = vpop.permute.xlu0 %823 }
0x162f   :  { %v826_v33 = vmul.f32 %v824_v32, %v809_v17 }
0x1631   :  { %v977_v34 = vpack.c.bf16 %v826_v33, %v826_v33 }
0x1632   :  { %v1168_v20 = vpop.permute.xlu0 %1167 }
0x1633   :  { %979 = vrot.lane.b32.xlu1 %v977_v34, %s2275_s12 }
0x16a5   :  { %v980_v41 = vpop.permute.xlu1 %979 }
0x16a6   :  { %2111 = vmatmul.mubr.msk.bf16.vlgmr.msra.gmra.mrb[16].mxu0 %vm246_vm4, %v980_v41 }
0x16a7   :  { %2118 = vmatprep.mubr.msk.bf16.mxu0 %vm2272_vm0, %v2271_v1 }
0x1779   :  { %v2549_v52 = vpop.f32.mrb[16].mxu0 }
0x177a   :  { %v1048_v55 = vcombine.high %v2549_v52, %v2549_v52  ;;  %v1055_v27 = vrot.slane %v2549_v52, %v1054_v50  ;;  %v2112_v57 = vpop.f32.mrb[17].mxu0 }
0x177b   :  { %v1033_v59 = vpop.f32.mrb[18].mxu0 }
0x177c   :  { %v1062_v61 = vrot.slane %v1048_v55, %v1054_v50  ;;  %v1063_v62 = vcombine.high %v1055_v27, %v1055_v27  ;;  %v1071_v63 = vrot.slane %v1055_v27, %v1054_v50  ;;  %v2113_v0 = vpop.f32.mrb[19].mxu0 }
0x177e   :  { %v1064_v2 = vcombine.high %v1062_v61, %v1062_v61  ;;  %v1100_v3 = vrot.slane %v1071_v63, %v2557_v58  ;;  %v1085_v4 = vrot.slane %v1063_v62, %v1054_v50  ;;  %v1093_v6 = vcombine.high %v1071_v63, %v1071_v63 }
0x177f   :  { %v1078_v9 = vrot.slane %v1062_v61, %v1054_v50 }
0x1780   :  { %1129 = vrot.lane.b32.xlu0 %v1100_v3, %s2275_s12  ;;  %v1104_v8 = vrot.slane %v1085_v4, %v2557_v58  ;;  %v1108_v10 = vrot.slane %v1093_v6, %v2557_v58  ;;  %v1092_v11 = vrot.slane %v1064_v2, %v1054_v50  ;;  %v1095_v13 = vcombine.high %v1085_v4, %v1085_v4  ;;  %v1259_v4 = vld [vmem:[%s2777_s2 + $0x4] sm:$0x1] }
0x1781   :  { %v1116_v12 = vrot.slane %v1078_v9, %v2557_v58  ;;  %v1094_v17 = vcombine.high %v1078_v9, %v1078_v9  ;;  %2142 = vpush %v1259_v4 }
0x1782   :  { %1131 = vrot.lane.b32.xlu1 %v1104_v8, %s2275_s12  ;;  %v1120_v14 = vrot.slane %v1092_v11, %v2557_v58  ;;  %v1096_v15 = vcombine.high %v1092_v11, %v1092_v11  ;;  %v1112_v16 = vrot.slane %v1095_v13, %v2557_v58 }
0x1783   :  { %v1124_v18 = vrot.slane %v1094_v17, %v2557_v58 }
0x1784   :  { %1133 = vrot.lane.b32.xlu0 %v1108_v10, %s2275_s12  ;;  %v1128_v19 = vrot.slane %v1096_v15, %v2557_v58 }
0x1786   :  { %1137 = vrot.lane.b32.xlu1 %v1116_v12, %s2275_s12 }
0x1788   :  { %1139 = vrot.lane.b32.xlu0 %v1120_v14, %s2275_s12 }
0x178a   :  { %1135 = vrot.lane.b32.xlu1 %v1112_v16, %s2275_s12 }
0x178c   :  { %1143 = vrot.lane.b32.xlu0 %v1128_v19, %s2275_s12 }
0x178e   :  { %1141 = vrot.lane.b32.xlu1 %v1124_v18, %s2275_s12 }
0x1792   :  { %1192 = vrot.lane.b32.xlu1 %v1917_v56, %s2275_s12 }
0x17b2   :  { %s2143_s25 = spop %2142 }
0x17f2   :  { %v1130_v21 = vpop.permute.xlu0 %1129 }
0x17f3   :  { %v1153_v25 = vadd.f32 %v1130_v21, %v2540_v47 }
0x17f4   :  { %v1132_v23 = vpop.permute.xlu1 %1131 }
0x17f5   :  { %v1154_v26 = vadd.f32 %v1132_v23, %v2544_v49  ;;  %v1170_v32 = vadd.f32 %v1168_v20, %v1153_v25 }
0x17f6   :  { %v1134_v30 = vpop.permute.xlu0 %1133 }
0x17f7   :  { %v1171_v5 = vadd.f32 %v1168_v20, %v1154_v26  ;;  %v1155_v33 = vadd.f32 %v2535_v43, %v1134_v30  ;;  %v1178_v35 = vmax.f32 %v1170_v32, 0.0 }
0x17f8   :  { %v1138_v24 = vpop.permute.xlu1 %1137 }
0x17f9   :  { %v1179_v36 = vmax.f32 %v1171_v5, 0.0  ;;  %v1172_v38 = vadd.f32 %v1168_v20, %v1155_v33  ;;  %v1157_v39 = vadd.f32 %v1138_v24, %v2551_v53  ;;  %v2612_v33 = vsub.s32 %v2367_v29, %v2538_v45 }
0x17fa   :  { %v1140_v28 = vpop.permute.xlu0 %1139 }
0x17fb   :  { %v1158_v40 = vadd.f32 %v1140_v28, %v2561_v60  ;;  %v1180_v55 = vmax.f32 %v1172_v38, 0.0  ;;  %v1174_v27 = vadd.f32 %v1168_v20, %v1157_v39 }
0x17fc   :  { %v1136_v31 = vpop.permute.xlu1 %1135 }
0x17fd   :  { %v1156_v34 = vadd.f32 %v2542_v48, %v1136_v31  ;;  %v1175_v57 = vadd.f32 %v1168_v20, %v1158_v40  ;;  %v1182_v2 = vmax.f32 %v1174_v27, 0.0  ;;  %v1262_v31 = vstv %s2143_s25 }
0x17fe   :  { %v1144_v37 = vpop.permute.xlu0 %1143 }
0x17ff   :  { %v1173_v41 = vadd.f32 %v1168_v20, %v1156_v34  ;;  %v1160_v44 = vadd.f32 %v2559_v54, %v1144_v37  ;;  %v1183_v3 = vmax.f32 %v1175_v57, 0.0 }
0x1800   :  { %v1142_v7 = vpop.permute.xlu1 %1141 }
0x1801   :  { %v1159_v22 = vadd.f32 %v2547_v51, %v1142_v7  ;;  %v1181_v59 = vmax.f32 %v1173_v41, 0.0  ;;  %v1177_v61 = vadd.f32 %v1168_v20, %v1160_v44 }
0x1803   :  { %v1176_v62 = vadd.f32 %v1168_v20, %v1159_v22  ;;  %v1185_v6 = vmax.f32 %v1177_v61, 0.0 }
0x1804   :  { %v1193_v42 = vpop.permute.xlu1 %1192 }
0x1805   :  { %v1195_v46 = vmul.f32 %v1193_v42, %v1178_v35  ;;  %v1196_v50 = vmul.f32 %v1193_v42, %v1179_v36  ;;  %v1197_v63 = vmul.f32 %v1193_v42, %v1180_v55  ;;  %v1198_v0 = vmul.f32 %v1193_v42, %v1181_v59 }
0x1806   :  { %v1184_v8 = vmax.f32 %v1176_v62, 0.0  ;;  %v1199_v9 = vmul.f32 %v1193_v42, %v1182_v2  ;;  %v1200_v10 = vmul.f32 %v1193_v42, %v1183_v3  ;;  %v1202_v12 = vmul.f32 %v1193_v42, %v1185_v6 }
0x1807   :  { %1211 = vrot.lane.b32.xlu0 %v1195_v46, %s2277_s22  ;;  %1213 = vrot.lane.b32.xlu1 %v1196_v50, %s2277_s22 }
0x1808   :  { %v1201_v11 = vmul.f32 %v1193_v42, %v1184_v8 }
0x180b   :  { %1215 = vrot.lane.b32.xlu0 %v1197_v63, %s2277_s22  ;;  %1217 = vrot.lane.b32.xlu1 %v1198_v0, %s2277_s22 }
0x180f   :  { %1219 = vrot.lane.b32.xlu0 %v1199_v9, %s2277_s22  ;;  %1221 = vrot.lane.b32.xlu1 %v1200_v10, %s2277_s22 }
0x1813   :  { %1223 = vrot.lane.b32.xlu0 %v1201_v11, %s2277_s22  ;;  %1225 = vrot.lane.b32.xlu1 %v1202_v12, %s2277_s22  ;;  %v1338_v11 = vsub.s32 1, %v2538_v45  ;;  %v1342_v12 = vsub.s32 2, %v2538_v45 }
0x1879   :  { %v1212_v13 = vpop.permute.xlu0 %1211  ;;  %v1214_v14 = vpop.permute.xlu1 %1213 }
0x187a   :  { %v1235_v15 = vsel %vm246_vm4, %v1212_v13, 0.0  ;;  %v1238_v16 = vsel %vm246_vm4, %v1214_v14, 0.0  ;;  %v1346_v13 = vsub.s32 3, %v2538_v45 }
0x187b   :  { %1236 = vadd.xlane.f32.xlu0 %v1235_v15  ;;  %1239 = vadd.xlane.f32.xlu1 %v1238_v16 }
0x187d   :  { %v1216_v17 = vpop.permute.xlu0 %1215  ;;  %v1218_v19 = vpop.permute.xlu1 %1217 }
0x187e   :  { %v1241_v18 = vsel %vm246_vm4, %v1216_v17, 0.0  ;;  %v1244_v21 = vsel %vm246_vm4, %v1218_v19, 0.0 }
0x187f   :  { %1242 = vadd.xlane.f32.xlu0 %v1241_v18 }
0x1881   :  { %v1220_v56 = vpop.permute.xlu0 %1219  ;;  %v1222_v20 = vpop.permute.xlu1 %1221 }
0x1882   :  { %v1247_v23 = vsel %vm246_vm4, %v1220_v56, 0.0  ;;  %v1250_v25 = vsel %vm246_vm4, %v1222_v20, 0.0  ;;  %v1350_v56 = vsub.s32 4, %v2538_v45 }
0x1883   :  { %1245 = vadd.xlane.f32.xlu0 %v1244_v21  ;;  %1248 = vadd.xlane.f32.xlu1 %v1247_v23 }
0x1885   :  { %v1224_v30 = vpop.permute.xlu0 %1223  ;;  %v1226_v26 = vpop.permute.xlu1 %1225 }
0x1886   :  { %v1253_v24 = vsel %vm246_vm4, %v1224_v30, 0.0  ;;  %v1256_v28 = vsel %vm246_vm4, %v1226_v26, 0.0 }
0x1887   :  { %1254 = vadd.xlane.f32.xlu1 %v1253_v24  ;;  %1251 = vadd.xlane.f32.xlu0 %v1250_v25  ;;  %v1354_v24 = vsub.s32 5, %v2538_v45 }
0x188b   :  { %1257 = vadd.xlane.f32.xlu0 %v1256_v28 }
0x1908   :  { %v1237_v32 = vpop.xlane.xlu0 %1236  ;;  %v1240_v5 = vpop.xlane.xlu1 %1239 }
0x1909   :  { %v1264_v34 = vadd.f32 %v1262_v31, %v1237_v32  ;;  %v1265_v7 = vadd.f32 %v1262_v31, %v1240_v5 }
0x190b   :  { %v1283_v37 = vrot.slane %v1264_v34, %v2612_v33  ;;  %v1287_v38 = vrot.slane %v1265_v7, %v2612_v33 }
0x190c   :  { %v1243_v35 = vpop.xlane.xlu0 %1242 }
0x190d   :  { %v1266_v36 = vadd.f32 %v1262_v31, %v1243_v35  ;;  %v1313_v29 = vsel %vm1312_vm5, %v1287_v38, %v1283_v37 }
0x190f   :  { %v1291_v39 = vrot.slane %v1266_v36, %v2612_v33 }
0x1910   :  { %v1246_v40 = vpop.xlane.xlu0 %1245  ;;  %v1249_v41 = vpop.xlane.xlu1 %1248 }
0x1911   :  { %v1267_v42 = vadd.f32 %v1262_v31, %v1246_v40  ;;  %v1268_v44 = vadd.f32 %v1262_v31, %v1249_v41  ;;  %v1315_v46 = vsel %vm1314_vm6, %v1291_v39, %v1313_v29 }
0x1913   :  { %v1295_v22 = vrot.slane %v1267_v42, %v2612_v33  ;;  %v1299_v50 = vrot.slane %v1268_v44, %v2612_v33 }
0x1914   :  { %v1252_v55 = vpop.xlane.xlu0 %1251  ;;  %v1255_v27 = vpop.xlane.xlu1 %1254 }
0x1915   :  { %v1317_v57 = vsel %vm1316_vm7, %v1295_v22, %v1315_v46  ;;  %v1269_v59 = vadd.f32 %v1262_v31, %v1252_v55  ;;  %v1270_v61 = vadd.f32 %v1262_v31, %v1255_v27 }
0x1916   :  { %v1319_v63 = vsel %vm1318_vm8, %v1299_v50, %v1317_v57 }
0x1917   :  { %v1303_v62 = vrot.slane %v1269_v59, %v2612_v33  ;;  %v1307_v0 = vrot.slane %v1270_v61, %v2612_v33 }
0x1918   :  { %v1258_v2 = vpop.xlane.xlu0 %1257 }
0x1919   :  { %v1271_v3 = vadd.f32 %v1262_v31, %v1258_v2  ;;  %v1321_v4 = vsel %vm1320_vm9, %v1303_v62, %v1319_v63  ;;  %v1358_v31 = vsub.s32 6, %v2538_v45 }
0x191a   :  { %v1323_v8 = vsel %vm1322_vm10, %v1307_v0, %v1321_v4 }
0x191b   :  { %v1311_v6 = vrot.slane %v1271_v3, %v2612_v33 }
0x191d   :  { %v1325_v9 = vsel %vm1324_vm11, %v1311_v6, %v1323_v8 }
0x191e   :  { %v1328_v10 = vsel %vm1327_vm12, %v1325_v9, -inf }
0x191f   :  { %1329 = vmax.xlane.f32.xlu1 %v1328_v10 }
0x19ac   :  { %v1330_v14 = vpop.xlane.xlu1 %1329 }
0x19ad   :  { %v1335_v15 = vrot.slane %v1330_v14, %v2557_v58  ;;  %v1339_v16 = vrot.slane %v1330_v14, %v1338_v11  ;;  %v1343_v17 = vrot.slane %v1330_v14, %v1342_v12  ;;  %v1347_v20 = vrot.slane %v1330_v14, %v1346_v13 }
0x19ae   :  { %v1351_v25 = vrot.slane %v1330_v14, %v1350_v56  ;;  %v1355_v32 = vrot.slane %v1330_v14, %v1354_v24  ;;  %v1359_v35 = vrot.slane %v1330_v14, %v1358_v31 }
0x19af   :  { %v1372_v19 = vsub.f32 %v1264_v34, %v1335_v15  ;;  %v1373_v18 = vsub.f32 %v1265_v7, %v1339_v16  ;;  %v1374_v21 = vsub.f32 %v1266_v36, %v1343_v17  ;;  %v1375_v26 = vsub.f32 %v1267_v42, %v1347_v20 }
0x19b0   :  { %v1376_v5 = vsub.f32 %v1268_v44, %v1351_v25  ;;  %v1362_v7 = vsub.s32 7, %v2538_v45  ;;  %v1377_v36 = vsub.f32 %v1269_v59, %v1355_v32  ;;  %v1378_v41 = vsub.f32 %v1270_v61, %v1359_v35  ;;  %v2698_v45 = vld [vmem:[%s2777_s2 + $0x1] ss:$0 sm:$0xff] }
0x19b1   :  { %v1380_v23 = vmul.f32 1.442695, %v1372_v19  ;;  %v1382_v30 = vmul.f32 1.442695, %v1373_v18  ;;  %v1384_v28 = vmul.f32 1.442695, %v1374_v21 }
0x19b2   :  { %v1386_v34 = vmul.f32 1.442695, %v1375_v26  ;;  %v1388_v37 = vmul.f32 1.442695, %v1376_v5  ;;  %v1363_v40 = vrot.slane %v1330_v14, %v1362_v7  ;;  %v1390_v42 = vmul.f32 1.442695, %v1377_v36 }
0x19b3   :  { %2253 = vpow2.f32 %v1380_v23  ;;  %v1392_v22 = vmul.f32 1.442695, %v1378_v41 }
0x19b4   :  { %2255 = vpow2.f32 %v1382_v30  ;;  %v1379_v29 = vsub.f32 %v1271_v3, %v1363_v40 }
0x19b5   :  { %2257 = vpow2.f32 %v1384_v28 }
0x19b6   :  { %2259 = vpow2.f32 %v1386_v34  ;;  %v1394_v50 = vmul.f32 1.442695, %v1379_v29 }
0x19b7   :  { %2261 = vpow2.f32 %v1388_v37 }
0x19b8   :  { %2263 = vpow2.f32 %v1390_v42 }
0x19b9   :  { %2265 = vpow2.f32 %v1392_v22 }
0x19ba   :  { %2267 = vpow2.f32 %v1394_v50  ;;  %v970_v50 = vadd.f32 %v2698_v45, %v2544_v49  ;;  %v972_v49 = vadd.f32 %v2542_v48, %v2698_v45 }
0x19bd   :  { %v2254_v38 = vpop.eup %2253 }
0x19be   :  { %v2256_v39 = vpop.eup %2255  ;;  %1405 = vperm.xlu0 %2151, %v2254_v38  }
0x19bf   :  { %1408 = vperm.xlu1 %2152, %v2256_v39   ;;  %v2258_v44 = vpop.eup %2257 }
0x19c0   :  { %v2260_v46 = vpop.eup %2259 }
0x19c1   :  { %v2262_v55 = vpop.eup %2261 }
0x19c2   :  { %v2264_v27 = vpop.eup %2263 }
0x19c3   :  { %1411 = vperm.xlu1 %2152, %v2258_v44   ;;  %v2266_v57 = vpop.eup %2265 }
0x19c4   :  { %v2268_v59 = vpop.eup %2267 }
0x19c7   :  { %1414 = vperm.xlu1 %2152, %v2260_v46  }
0x19cb   :  { %1417 = vperm.xlu1 %2152, %v2262_v55  }
0x19cf   :  { %1420 = vperm.xlu1 %2152, %v2264_v27  }
0x19d3   :  { %1423 = vperm.xlu1 %2152, %v2266_v57  }
0x19d7   :  { %1426 = vperm.xlu1 %2152, %v2268_v59  }
0x1a3d   :  { %v1406_v2 = vpop.permute.xlu0 %1405 }
0x1a3e   :  { %v1409_v61 = vpop.permute.xlu1 %1408  ;;  %v1431_v6 = vrot.slane %v1406_v2, %v2612_v33 }
0x1a3f   :  { %v1435_v4 = vrot.slane %v1409_v61, %v2612_v33 }
0x1a41   :  { %v1460_v15 = vsel %vm1312_vm5, %v1435_v4, %v1431_v6 }
0x1a42   :  { %v1412_v62 = vpop.permute.xlu1 %1411 }
0x1a43   :  { %v1439_v8 = vrot.slane %v1412_v62, %v2612_v33  ;;  %v971_v62 = vadd.f32 %v2535_v43, %v2698_v45 }
0x1a45   :  { %v1461_v17 = vsel %vm1314_vm6, %v1439_v8, %v1460_v15 }
0x1a46   :  { %v1415_v63 = vpop.permute.xlu1 %1414 }
0x1a47   :  { %v1443_v9 = vrot.slane %v1415_v63, %v2612_v33 }
0x1a49   :  { %v1462_v18 = vsel %vm1316_vm7, %v1443_v9, %v1461_v17 }
0x1a4a   :  { %v1418_v0 = vpop.permute.xlu1 %1417 }
0x1a4b   :  { %v1447_v10 = vrot.slane %v1418_v0, %v2612_v33 }
0x1a4d   :  { %v1463_v20 = vsel %vm1318_vm8, %v1447_v10, %v1462_v18  ;;  %v973_v18 = vadd.f32 %v2698_v45, %v2551_v53 }
0x1a4e   :  { %v1421_v3 = vpop.permute.xlu1 %1420 }
0x1a4f   :  { %v1451_v16 = vrot.slane %v1421_v3, %v2612_v33 }
0x1a51   :  { %v1464_v23 = vsel %vm1320_vm9, %v1451_v16, %v1463_v20 }
0x1a52   :  { %v1424_v14 = vpop.permute.xlu1 %1423 }
0x1a53   :  { %v1455_v19 = vrot.slane %v1424_v14, %v2612_v33 }
0x1a55   :  { %v1465_v25 = vsel %vm1322_vm10, %v1455_v19, %v1464_v23 }
0x1a56   :  { %v1427_v21 = vpop.permute.xlu1 %1426 }
0x1a57   :  { %v1459_v30 = vrot.slane %v1427_v21, %v2612_v33 }
0x1a59   :  { %v1466_v26 = vsel %vm1324_vm11, %v1459_v30, %v1465_v25 }
0x1a5a   :  { %v1468_v28 = vsel %vm1327_vm12, %v1466_v26, 0.0 }
0x1a5b   :  { %1469 = vadd.xlane.f32.xlu1 %v1468_v28 }
0x1ae8   :  { %v1470_v32 = vpop.xlane.xlu1 %1469 }
0x1ae9   :  { %2269 = vrcp.f32 %v1470_v32 }
0x1af3   :  { %v2270_v5 = vpop.eup %2269 }
0x1af4   :  { %v1476_v34 = vrot.slane %v2270_v5, %v2557_v58  ;;  %v1480_v36 = vrot.slane %v2270_v5, %v1338_v11  ;;  %v1484_v33 = vrot.slane %v2270_v5, %v1342_v12  ;;  %v1488_v41 = vrot.slane %v2270_v5, %v1346_v13 }
0x1af5   :  { %v1492_v29 = vrot.slane %v2270_v5, %v1350_v56  ;;  %v1496_v11 = vrot.slane %v2270_v5, %v1354_v24  ;;  %v1500_v12 = vrot.slane %v2270_v5, %v1358_v31  ;;  %v1504_v13 = vrot.slane %v2270_v5, %v1362_v7  ;;  %v1915_v56 = vld [vmem:[%s2777_s2 + $0x5] ss:$0 sm:$0xff]  ;;  %v2182_v31 = vld [vmem:[%s2775_s1 + $0xa8] sm:$0xff]  }
0x1af6   :  { %v1513_v35 = vmul.f32 %v2254_v38, %v1476_v34  ;;  %v1514_v37 = vmul.f32 %v2256_v39, %v1480_v36  ;;  %v1515_v40 = vmul.f32 %v2258_v44, %v1484_v33  ;;  %v1516_v42 = vmul.f32 %v2260_v46, %v1488_v41  ;;  %v2181_v24 = vld [vmem:[%s2775_s1 + $0xa0] sm:$0xff]  }
0x1af7   :  { %v1517_v58 = vmul.f32 %v2262_v55, %v1492_v29  ;;  %v1518_v38 = vmul.f32 %v2264_v27, %v1496_v11  ;;  %v1519_v39 = vmul.f32 %v2266_v57, %v1500_v12  ;;  %v1520_v44 = vmul.f32 %v2268_v59, %v1504_v13  ;;  %2115 = vmatpush3.bf16.msra.mxu0 %v2181_v24 }
0x1af8   :  { %1523 = vperm.xlu0 %2151, %v1513_v35   ;;  %2116 = vmatprep.subr.bf16.mxu0 %v2271_v1  ;;  %v969_v7 = vadd.f32 %v2698_v45, %v2540_v47  ;;  %v974_v34 = vadd.f32 %v2698_v45, %v2561_v60  ;;  %v975_v12 = vadd.f32 %v2547_v51, %v2698_v45 }
0x1afb   :  { %2117 = vmatpush3.bf16.msra.mxu0 %v2182_v31 }
0x1afc   :  { %1528 = vperm.xlu0 %2151, %v1514_v37   ;;  %2122 = vmatprep.subr.bf16.mxu0 %v2271_v1 }
0x1b00   :  { %1533 = vperm.xlu0 %2151, %v1515_v40  }
0x1b04   :  { %1538 = vperm.xlu0 %2151, %v1516_v42  }
0x1b08   :  { %1543 = vperm.xlu0 %2151, %v1517_v58  }
0x1b0c   :  { %1548 = vperm.xlu0 %2151, %v1518_v38  }
0x1b10   :  { %1553 = vperm.xlu0 %2151, %v1519_v39  }
0x1b14   :  { %1558 = vperm.xlu0 %2151, %v1520_v44  }
0x1b18   :  { %1042 = vrot.lane.b32.xlu0 %v1915_v56, %s2275_s12 }
0x1b77   :  { %v1524_v22 = vpop.permute.xlu0 %1523 }
0x1b78   :  { %v1561_v46 = vmul.f32 %v1524_v22, %v969_v7 }
0x1b7a   :  { %v1569_v55 = vsel %vm246_vm4, %v1561_v46, 0.0 }
0x1b7b   :  { %v1570_v27 = vrot.slane %v1569_v55, 4  ;;  %v1529_v57 = vpop.permute.xlu0 %1528 }
0x1b7c   :  { %v1562_v59 = vmul.f32 %v1529_v57, %v970_v50 }
0x1b7d   :  { %v1571_v61 = vadd.f32 %v1570_v27, %v1569_v55  ;;  %v976_v55 = vadd.f32 %v2559_v54, %v2698_v45 }
0x1b7e   :  { %v1576_v63 = vsel %vm246_vm4, %v1562_v59, 0.0 }
0x1b7f   :  { %v1572_v0 = vrot.slane %v1571_v61, 2  ;;  %v1577_v2 = vrot.slane %v1576_v63, 4  ;;  %v1534_v3 = vpop.permute.xlu0 %1533 }
0x1b80   :  { %v1563_v47 = vmul.f32 %v1534_v3, %v971_v62 }
0x1b81   :  { %v1573_v4 = vadd.f32 %v1572_v0, %v1571_v61  ;;  %v1578_v6 = vadd.f32 %v1577_v2, %v1576_v63 }
0x1b82   :  { %v1583_v8 = vsel %vm246_vm4, %v1563_v47, 0.0 }
0x1b83   :  { %v1574_v9 = vrot.slane %v1573_v4, 1  ;;  %v1579_v10 = vrot.slane %v1578_v6, 2  ;;  %v1584_v14 = vrot.slane %v1583_v8, 4  ;;  %v1539_v15 = vpop.permute.xlu0 %1538 }
0x1b84   :  { %v1564_v16 = vmul.f32 %v1539_v15, %v972_v49 }
0x1b85   :  { %v1575_v17 = vadd.f32 %v1574_v9, %v1573_v4  ;;  %v1580_v43 = vadd.f32 %v1579_v10, %v1578_v6  ;;  %v1585_v19 = vadd.f32 %v1584_v14, %v1583_v8 }
0x1b86   :  { %v1590_v20 = vsel %vm246_vm4, %v1564_v16, 0.0 }
0x1b87   :  { %v1581_v21 = vrot.slane %v1580_v43, 1  ;;  %v1586_v23 = vrot.slane %v1585_v19, 2  ;;  %v1591_v30 = vrot.slane %v1590_v20, 4  ;;  %v1544_v25 = vpop.permute.xlu0 %1543  ;;  %v1625_v48 = vpack.c.bf16 %v1575_v17, %v1575_v17 }
0x1b88   :  { %v1565_v26 = vmul.f32 %v1544_v25, %v973_v18 }
0x1b89   :  { %v1582_v28 = vadd.f32 %v1581_v21, %v1580_v43  ;;  %v1587_v32 = vadd.f32 %v1586_v23, %v1585_v19  ;;  %v1592_v5 = vadd.f32 %v1591_v30, %v1590_v20  ;;  %v1641_v41 = vunpack.c.l.b16 %v1625_v48 }
0x1b8a   :  { %v1597_v35 = vsel %vm246_vm4, %v1565_v26, 0.0 }
0x1b8b   :  { %v1626_v36 = vpack.c.bf16 %v1582_v28, %v1582_v28  ;;  %v1588_v37 = vrot.slane %v1587_v32, 1  ;;  %v1593_v33 = vrot.slane %v1592_v5, 2  ;;  %v1598_v53 = vrot.slane %v1597_v35, 4  ;;  %v1549_v40 = vpop.permute.xlu0 %1548 }
0x1b8c   :  { %v1566_v42 = vmul.f32 %v1549_v40, %v974_v34  ;;  %v2184_v40 = vld [vmem:[%s2775_s1 + $0xb8] sm:$0xff]  }
0x1b8d   :  { %v1642_v29 = vunpack.c.l.b16 %v1626_v36  ;;  %v1589_v58 = vadd.f32 %v1588_v37, %v1587_v32  ;;  %v1594_v11 = vadd.f32 %v1593_v33, %v1592_v5  ;;  %v1599_v38 = vadd.f32 %v1598_v53, %v1597_v35  ;;  %v2183_v33 = vld [vmem:[%s2775_s1 + $0xb0] sm:$0xff]   ;;  %v1921_v53 = vld [vmem:[%s2777_s2 + $0x6] ss:$0 sm:$0xff] }
0x1b8e   :  { %v1604_v39 = vsel %vm246_vm4, %v1566_v42, 0.0 }
0x1b8f   :  { %v1649_v60 = vsel %vm1312_vm5, %v1642_v29, %v1641_v41  ;;  %v1627_v13 = vpack.c.bf16 %v1589_v58, %v1589_v58  ;;  %v1595_v44 = vrot.slane %v1594_v11, 1  ;;  %v1600_v56 = vrot.slane %v1599_v38, 2  ;;  %v1554_v24 = vpop.permute.xlu0 %1553 }
0x1b90   :  { %v1605_v31 = vrot.slane %v1604_v39, 4  ;;  %v1567_v7 = vmul.f32 %v1554_v24, %v975_v12  ;;  %v2185_v24 = vld [vmem:[%s2775_s1 + $0xc0] sm:$0xff]  }
0x1b91   :  { %v1643_v22 = vunpack.c.l.b16 %v1627_v13  ;;  %v1596_v46 = vadd.f32 %v1595_v44, %v1594_v11  ;;  %v1601_v50 = vadd.f32 %v1600_v56, %v1599_v38 }
0x1b92   :  { %v1606_v27 = vadd.f32 %v1605_v31, %v1604_v39  ;;  %v1611_v57 = vsel %vm246_vm4, %v1567_v7, 0.0  ;;  %v2186_v7 = vld [vmem:[%s2775_s1 + $0xc8] sm:$0xff]  }
0x1b93   :  { %v1650_v51 = vsel %vm1314_vm6, %v1643_v22, %v1649_v60  ;;  %v1628_v59 = vpack.c.bf16 %v1596_v46, %v1596_v46  ;;  %v1602_v61 = vrot.slane %v1601_v50, 1  ;;  %v1612_v62 = vrot.slane %v1611_v57, 4  ;;  %v1559_v63 = vpop.permute.xlu0 %1558  ;;  %v2188_v22 = vld [vmem:[%s2775_s1 + $0xd8] sm:$0xff]   ;;  %v1925_v46 = vld [vmem:[%s2777_s2 + $0x7] ss:$0 sm:$0xff] }
0x1b94   :  { %v1607_v0 = vrot.slane %v1606_v27, 2  ;;  %v1568_v2 = vmul.f32 %v1559_v63, %v976_v55 }
0x1b95   :  { %v1644_v3 = vunpack.c.l.b16 %v1628_v59  ;;  %v1603_v47 = vadd.f32 %v1602_v61, %v1601_v50  ;;  %v1613_v4 = vadd.f32 %v1612_v62, %v1611_v57  ;;  %v1926_v62 = vld [vmem:[%s2777_s2 + $0x8] ss:$0 sm:$0xff] }
0x1b96   :  { %v1608_v6 = vadd.f32 %v1607_v0, %v1606_v27  ;;  %v1618_v49 = vsel %vm246_vm4, %v1568_v2, 0.0 }
0x1b97   :  { %v1651_v8 = vsel %vm1316_vm7, %v1644_v3, %v1650_v51  ;;  %v1629_v54 = vpack.c.bf16 %v1603_v47, %v1603_v47  ;;  %v1614_v45 = vrot.slane %v1613_v4, 2  ;;  %v1619_v9 = vrot.slane %v1618_v49, 4  ;;  %v1043_v12 = vpop.permute.xlu0 %1042 }
0x1b98   :  { %v1609_v10 = vrot.slane %v1608_v6, 1  ;;  %v1045_v39 = vadd.f32 %v1043_v12, %v2549_v52  ;;  %v2187_v52 = vld [vmem:[%s2775_s1 + $0xd0] sm:$0xff]  }
0x1b99   :  { %v1645_v14 = vunpack.c.l.b16 %v1629_v54  ;;  %v1615_v15 = vadd.f32 %v1614_v45, %v1613_v4  ;;  %v1620_v16 = vadd.f32 %v1619_v9, %v1618_v49 }
0x1b9a   :  { %v1610_v17 = vadd.f32 %v1609_v10, %v1608_v6  ;;  %v1046_v60 = vmax.f32 %v1045_v39, 0.0 }
0x1b9b   :  { %v1652_v43 = vsel %vm1318_vm8, %v1645_v14, %v1651_v8  ;;  %v1616_v19 = vrot.slane %v1615_v15, 1  ;;  %v1621_v18 = vrot.slane %v1620_v16, 2 }
0x1b9c   :  { %v1630_v20 = vpack.c.bf16 %v1610_v17, %v1610_v17 }
0x1b9d   :  { %v1617_v21 = vadd.f32 %v1616_v19, %v1615_v15  ;;  %v1622_v23 = vadd.f32 %v1621_v18, %v1620_v16 }
0x1b9e   :  { %v1646_v30 = vunpack.c.l.b16 %v1630_v20 }
0x1b9f   :  { %v1631_v25 = vpack.c.bf16 %v1617_v21, %v1617_v21  ;;  %v1623_v48 = vrot.slane %v1622_v23, 1 }
0x1ba0   :  { %v1653_v26 = vsel %vm1320_vm9, %v1646_v30, %v1652_v43 }
0x1ba1   :  { %v1647_v28 = vunpack.c.l.b16 %v1631_v25  ;;  %v1624_v32 = vadd.f32 %v1623_v48, %v1622_v23 }
0x1ba3   :  { %v1654_v5 = vsel %vm1322_vm10, %v1647_v28, %v1653_v26  ;;  %v1632_v34 = vpack.c.bf16 %v1624_v32, %v1624_v32 }
0x1ba5   :  { %v1648_v35 = vunpack.c.l.b16 %v1632_v34 }
0x1ba7   :  { %v1655_v36 = vsel %vm1324_vm11, %v1648_v35, %v1654_v5 }
0x1ba8   :  { %v1656_v37 = vpack.c.b16 %v1655_v36, %v1655_v36 }
0x1baa   :  { %2119 = vmatmul.mubr.msk.bf16.vlgmr.msra.gmra.mrb[20].mxu0 %vm246_vm4, %v1656_v37 }
0x1bab   :  { %2126 = vmatprep.mubr.msk.bf16.mxu0 %vm2272_vm0, %v2271_v1  ;;  %2123 = vmatpush3.bf16.msra.mxu0 %v2183_v33 }
0x1bac   :  { %2124 = vmatprep.subr.bf16.mxu0 %v2271_v1 }
0x1baf   :  { %2125 = vmatpush3.bf16.msra.mxu0 %v2184_v40 }
0x1bb0   :  { %2130 = vmatprep.subr.bf16.mxu0 %v2271_v1 }
0x1c7d   :  { %v1706_v41 = vpop.f32.mrb[20].mxu0 }
0x1c7e   :  { %v1717_v42 = vadd.f32 %v1921_v53, %v1706_v41  ;;  %v2120_v29 = vpop.f32.mrb[21].mxu0 }
0x1c7f   :  { %v1709_v58 = vpop.f32.mrb[22].mxu0 }
0x1c80   :  { %v1718_v11 = vmax.f32 %v1717_v42, 0.0  ;;  %v2121_v38 = vpop.f32.mrb[23].mxu0 }
0x1c82   :  { %1720 = vrot.lane.b32.xlu1 %v1718_v11, %s2275_s12 }
0x1cf4   :  { %v1721_v13 = vpop.permute.xlu1 %1720 }
0x1cf5   :  { %v1723_v44 = vmul.f32 %v1721_v13, %v1046_v60 }
0x1cf7   :  { %v1724_v56 = vpack.c.bf16 %v1723_v44, %v1723_v44 }
0x1cf9   :  { %1726 = vrot.lane.b32.xlu0 %v1724_v56, %s2277_s22 }
0x1d6b   :  { %v1727_v31 = vpop.permute.xlu0 %1726 }
0x1d6c   :  { %2127 = vmatmul.mubr.msk.bf16.vlgmr.msra.gmra.mrb[24].mxu0 %vm246_vm4, %v1727_v31 }
0x1d6d   :  { %2131 = vmatpush3.bf16.msra.mxu0 %v2185_v24  ;;  %2138 = vmatprep.mubr.msk.bf16.mxu0 %vm2272_vm0, %v2271_v1 }
0x1d6e   :  { %2132 = vmatprep.subr.bf16.mxu0 %v2271_v1 }
0x1d71   :  { %2133 = vmatpush3.bf16.msra.mxu0 %v2186_v7 }
0x1d72   :  { %2134 = vmatprep.subr.bf16.mxu0 %v2271_v1 }
0x1d75   :  { %2135 = vmatpush3.bf16.msra.mxu0 %v2187_v52 }
0x1d76   :  { %2136 = vmatprep.subr.bf16.mxu0 %v2271_v1 }
0x1d79   :  { %2137 = vmatpush3.bf16.msra.mxu0 %v2188_v22 }
0x1e3f   :  { %v1777_v50 = vpop.f32.mrb[24].mxu0 }
0x1e40   :  { %v1788_v55 = vadd.f32 %v1925_v46, %v1777_v50  ;;  %v2128_v27 = vpop.f32.mrb[25].mxu0 }
0x1e41   :  { %v1780_v57 = vpop.f32.mrb[26].mxu0 }
0x1e42   :  { %v1789_v51 = vmax.f32 %v1788_v55, 0.0  ;;  %v2129_v59 = vpop.f32.mrb[27].mxu0 }
0x1e44   :  { %v1790_v61 = vpack.c.bf16 %v1789_v51, %v1789_v51 }
0x1e46   :  { %2139 = vmatmul.mubr.msk.bf16.vlgmr.msra.gmra.mrb[28].mxu0 %vm1820_vm13, %v1790_v61 }
0x1f19   :  { %v1858_v63 = vpop.f32.mrb[28].mxu0 }
0x1f1a   :  { %v1859_v1 = vadd.f32 %v1926_v62, %v1858_v63  ;;  %v2140_v0 = vpop.f32.mrb[29].mxu0 }
0x1f1b   :  { %v1861_v2 = vpop.f32.mrb[30].mxu0 }
0x1f1c   :  { %1864 = vst [vmem:[%s2778_s3] sm:$0xff] %v1859_v1  ;;  %v2141_v3 = vpop.f32.mrb[31].mxu0 }

</bundles_post_ra>
